<compile_context>
chip_gen: v7x
topology: tpu7x:2x2x1
jax: 0.10.0
libtpu: 0.0.40
codegen_flags: <defaults>
</compile_context>

<pallas_src>
import functools

import jax
import jax.numpy as jnp
from jax.experimental import pallas as pl
from jax.experimental.pallas import tpu as pltpu


def _round_up(x, m):
    return (x + m - 1) // m * m


def _pick_batch_tile(H, W):
    # Keep B_tile * H * W around <= 8K rows so the f32 conv intermediate and
    # the double-buffered bf16 input block stay small even on v7x (64 MiB VMEM).
    rows = max(H * W, 1)
    bt = (8192 // rows) // 8 * 8
    return max(8, min(64, bt))


# ----------------------------------------------------------------------------
# Fused kernel: im2col-conv(K=27) + folded BN + ReLU + global pool + Linear
# ----------------------------------------------------------------------------
def fused_stem_head_kernel(p_ref, w27_ref, scale_ref, shift_ref,
                           wl_ref, bl_ref, o_ref, *, pool_type, inv_hw):
    # p_ref:     (B_tile, H, W, 27)  bf16 im2col patches (tap order dy,dx,cin)
    # w27_ref:   (27, Cp)            bf16 conv weight, Cp = pad(C_stem, 128)
    # scale_ref: (1, Cp)  f32        gamma / sqrt(var + eps)   (padded lanes = 1)
    # shift_ref: (1, Cp)  f32        beta - mean * scale       (padded lanes = 0)
    # wl_ref:    (Cp, NCp) bf16      Linear weight^T, padded rows/cols = 0
    # bl_ref:    (1, NCp) f32        Linear bias, padded = 0
    # o_ref:     (B_tile, NCp) f32   lane-dense logits (sliced in the wrapper)
    B, H, W, K = p_ref.shape
    Cp = w27_ref.shape[1]

    patches = p_ref[...].reshape(B * H * W, K)
    # Single MXU matmul, f32 accumulation.
    conv = jnp.dot(patches, w27_ref[...], preferred_element_type=jnp.float32)
    # Folded BatchNorm + ReLU in f32 (v5e has no bf16 VPU).
    y = jnp.maximum(conv * scale_ref[...] + shift_ref[...], 0.0)
    y = y.reshape(B, H * W, Cp)

    avg = jnp.sum(y, axis=1) * inv_hw          # (B, Cp)
    mx = jnp.max(y, axis=1)                    # (B, Cp)
    if pool_type == "avg":
        pooled = avg
    elif pool_type == "max":
        pooled = mx
    else:  # 'avgmax' (timm semantics: 0.5 * (avg + max), feat_mult = 1)
        pooled = 0.5 * (avg + mx)

    logits = jnp.dot(pooled.astype(wl_ref.dtype), wl_ref[...],
                     preferred_element_type=jnp.float32) + bl_ref[...]
    o_ref[...] = logits.astype(o_ref.dtype)


def fused_stem_head(patches, w27, bn_scale, bn_shift, wl, bl, *,
                    pool_type, b_tile):
    n_pad, H, W, K = patches.shape
    Cp = w27.shape[1]
    NCp = wl.shape[1]
    kern = functools.partial(fused_stem_head_kernel,
                             pool_type=pool_type, inv_hw=1.0 / (H * W))
    return pl.pallas_call(
        kern,
        out_shape=jax.ShapeDtypeStruct((n_pad, NCp), jnp.float32),
        grid_spec=pltpu.PrefetchScalarGridSpec(
            num_scalar_prefetch=0,
            grid=(n_pad // b_tile,),
            in_specs=[
                pl.BlockSpec((b_tile, H, W, K), lambda n: (n, 0, 0, 0)),
                pl.BlockSpec((K, Cp), lambda n: (0, 0)),
                pl.BlockSpec((1, Cp), lambda n: (0, 0)),
                pl.BlockSpec((1, Cp), lambda n: (0, 0)),
                pl.BlockSpec((Cp, NCp), lambda n: (0, 0)),
                pl.BlockSpec((1, NCp), lambda n: (0, 0)),
            ],
            out_specs=pl.BlockSpec((b_tile, NCp), lambda n: (n, 0)),
        ),
        compiler_params=pltpu.CompilerParams(
            dimension_semantics=("parallel",),
            vmem_limit_bytes=32 * 1024 * 1024),
    )(patches, w27, bn_scale, bn_shift, wl, bl)


# ----------------------------------------------------------------------------
# Model wrapper (glue in plain JAX; all per-pixel compute in the kernel above)
# ----------------------------------------------------------------------------
class CodeToCifarModelPallas:
    INFOS = {
        "first_channel": [28 * 4, 32 * 4, 36 * 4],
        "stem_ratio": [0.75],
        "channel_multiplier": [1.5, 2, 2.5],
        "channel_ratio": [1],
    }
    POOL = {0: "avg", 1: "avgmax", 2: "max"}
    LANE = 128

    def __init__(self, Code, num_classes, auxiliary, key):
        FirstPart, SecondPart, ThirdPart, ForthPart = Code
        _, first_channel, _, _, _ = FirstPart
        self._channel = self.INFOS["first_channel"][first_channel]
        self.stem_channels = int(self._channel * self.INFOS["stem_ratio"][0])
        self.num_classes = num_classes
        self.auxiliary = auxiliary
        self.pool_type = self.POOL[ForthPart[3]]

        C = self.stem_channels
        # TODO(synk): cells are identity here, so the Linear input width equals
        # the stem output channel count (will change once real cells exist).
        in_feats = C
        Cp = _round_up(C, self.LANE)
        NCp = _round_up(num_classes, self.LANE)
        self.c_pad, self.nc_pad = Cp, NCp

        k1, k2, k3 = jax.random.split(key, 3)

        # Conv2d(3, C, 3, padding=1, bias=False): PyTorch weight (Cout, Cin, kH, kW)
        self.w_conv = jax.random.normal(k1, (C, 3, 3, 3), jnp.float32) * 0.1
        # Flatten to the (27, Cout) im2col weight; tap order (dy, dx, cin)
        # matches the wrapper's patch construction.
        w27 = jnp.transpose(self.w_conv, (2, 3, 1, 0)).reshape(27, C)
        self.w27 = (jnp.zeros((27, Cp), jnp.float32)
                    .at[:, :C].set(w27).astype(jnp.bfloat16))

        # BatchNorm2d defaults (eval): gamma=1, beta=0, mean=0, var=1, eps=1e-5
        gamma = jnp.ones((C,), jnp.float32)
        beta = jnp.zeros((C,), jnp.float32)
        r_mean = jnp.zeros((C,), jnp.float32)
        r_var = jnp.ones((C,), jnp.float32)
        eps = 1e-5
        scale = gamma / jnp.sqrt(r_var + eps)
        shift = beta - r_mean * scale
        self.bn_scale_f32 = scale
        self.bn_shift_f32 = shift
        self.bn_scale = jnp.ones((1, Cp), jnp.float32).at[0, :C].set(scale)
        self.bn_shift = jnp.zeros((1, Cp), jnp.float32).at[0, :C].set(shift)

        # Linear(in_feats, num_classes): PyTorch weight (num_classes, in_feats)
        self.w_lin = jax.random.normal(k2, (num_classes, in_feats),
                                       jnp.float32) * 0.05
        self.b_lin = jax.random.normal(k3, (num_classes,), jnp.float32) * 0.01
        self.wl = (jnp.zeros((Cp, NCp), jnp.float32)
                   .at[:in_feats, :num_classes].set(self.w_lin.T)
                   .astype(jnp.bfloat16))
        self.bl = (jnp.zeros((1, NCp), jnp.float32)
                   .at[0, :num_classes].set(self.b_lin))

    def __call__(self, x_nchw):
        N, _, H, W = x_nchw.shape
        # NCHW -> NHWC, 1px halo, im2col to (N, H, W, 27); Cin=3 so this stays tiny.
        x = jnp.transpose(x_nchw, (0, 2, 3, 1))
        x_pad = jnp.pad(x, ((0, 0), (1, 1), (1, 1), (0, 0)))
        patches = jnp.concatenate(
            [x_pad[:, dy:dy + H, dx:dx + W, :]
             for dy in range(3) for dx in range(3)],
            axis=-1).astype(jnp.bfloat16)                    # (N, H, W, 27)

        # Batch tile: multiple of 8 (sublane-friendly output block), capped so
        # a whole tile's f32 activation fits comfortably in VMEM on v7x too.
        b_tile = min(_pick_batch_tile(H, W), _round_up(N, 8))
        n_pad = _round_up(N, b_tile)
        if n_pad != N:
            patches = jnp.pad(patches,
                              ((0, n_pad - N), (0, 0), (0, 0), (0, 0)))

        logits_pad = fused_stem_head(
            patches, self.w27, self.bn_scale, self.bn_shift, self.wl, self.bl,
            pool_type=self.pool_type, b_tile=b_tile)
        logits = logits_pad[:N, :self.num_classes]

        # TODO(synk): NAS cell loop + auxiliary head not available -> identity / None.
        logits_aux = None
        return logits, logits_aux


# ----------------------------------------------------------------------------
# Pure-JAX f32 reference (conv + BN + ReLU + pool + linear) for a sanity check
# ----------------------------------------------------------------------------
def reference_forward(x_nchw, model):
    y = jax.lax.conv_general_dilated(
        x_nchw, model.w_conv, window_strides=(1, 1), padding="SAME",
        dimension_numbers=("NCHW", "OIHW", "NCHW"))
    y = (y * model.bn_scale_f32[None, :, None, None]
         + model.bn_shift_f32[None, :, None, None])
    y = jnp.maximum(y, 0.0)
    avg = jnp.mean(y, axis=(2, 3))
    mx = jnp.max(y, axis=(2, 3))
    if model.pool_type == "avg":
        pooled = avg
    elif model.pool_type == "max":
        pooled = mx
    else:
        pooled = 0.5 * (avg + mx)
    return pooled @ model.w_lin.T + model.b_lin


if __name__ == "__main__":
    key = jax.random.PRNGKey(0)
    k_x, k_p = jax.random.split(key)

    # A valid Code within the documented ranges.
    Code = [
        [1, 0, 0, 0, 0],   # stem=1, first_channel=112 -> stem 84 ch
        [0, 0, 0, 0, 0],
        [0, 0, 0, 0, 0],
        [0, 0, 0, 0, -1],  # CC index 0 -> 'avg' global pool
    ]
    num_classes = 10
    model = CodeToCifarModelPallas(Code, num_classes, auxiliary=False, key=k_p)

    # Small CIFAR-like input, NCHW as PyTorch would provide.
    x = jax.random.normal(k_x, (2, 3, 16, 16), jnp.float32)

    logits, logits_aux = model(x)
    logits = jax.block_until_ready(logits)
    assert logits.shape == (2, num_classes)
    assert logits_aux is None
    assert bool(jnp.all(jnp.isfinite(logits)))

    ref = reference_forward(x, model)
    assert bool(jnp.allclose(logits, ref, rtol=5e-2, atol=5e-2)), (logits, ref)
    print("KERNEL_OK")
</pallas_src>

<mosaic_0001>
module attributes {stable_mosaic.version = 11 : i64} {
  func.func @fused_stem_head_kernel(%arg0: i32, %arg1: memref<8x16x16x27xbf16, #tpu.memory_space<vmem>>, %arg2: memref<27x128xbf16, #tpu.memory_space<vmem>>, %arg3: memref<1x128xf32, #tpu.memory_space<vmem>>, %arg4: memref<1x128xf32, #tpu.memory_space<vmem>>, %arg5: memref<128x128xbf16, #tpu.memory_space<vmem>>, %arg6: memref<1x128xf32, #tpu.memory_space<vmem>>, %arg7: memref<8x128xf32, #tpu.memory_space<vmem>>) attributes {dimension_semantics = [#tpu.dimension_semantics<parallel>], iteration_bounds = array<i64: 1>, scalar_prefetch = 0 : i64, scratch_operands = 0 : i64, tpu.core_type = #tpu.core_type<tc>, window_params = [{transform_indices = @transform_0, window_bounds = array<i64: 8, 16, 16, 27>}, {pipeline_mode = #tpu.pipeline_mode<synchronous>, transform_indices = @transform_1, window_bounds = array<i64: 27, 128>}, {pipeline_mode = #tpu.pipeline_mode<synchronous>, transform_indices = @transform_2, window_bounds = array<i64: 1, 128>}, {pipeline_mode = #tpu.pipeline_mode<synchronous>, transform_indices = @transform_3, window_bounds = array<i64: 1, 128>}, {pipeline_mode = #tpu.pipeline_mode<synchronous>, transform_indices = @transform_4, window_bounds = array<i64: 128, 128>}, {pipeline_mode = #tpu.pipeline_mode<synchronous>, transform_indices = @transform_5, window_bounds = array<i64: 1, 128>}, {transform_indices = @transform_6, window_bounds = array<i64: 8, 128>}]} {
    %c0 = arith.constant 0 : index
    %c0_0 = arith.constant 0 : index
    %c0_1 = arith.constant 0 : index
    %c0_2 = arith.constant 0 : index
    %0 = vector.load %arg1[%c0, %c0_0, %c0_1, %c0_2] : memref<8x16x16x27xbf16, #tpu.memory_space<vmem>>, vector<8x16x16x27xbf16>
    %1 = vector.shape_cast %0 : vector<8x16x16x27xbf16> to vector<2048x27xbf16>
    %c0_3 = arith.constant 0 : index
    %c0_4 = arith.constant 0 : index
    %2 = vector.load %arg2[%c0_3, %c0_4] : memref<27x128xbf16, #tpu.memory_space<vmem>>, vector<27x128xbf16>
    %cst = arith.constant dense<0.000000e+00> : vector<2048x128xf32>
    %3 = tpu.matmul %1, %2, %cst {dimension_numbers = #tpu.dot_dimension_numbers<[1], [0], [0], [1], [0, 0, 1, 1], [], []>} : vector<2048x27xbf16>, vector<27x128xbf16>, vector<2048x128xf32> -> vector<2048x128xf32>
    %c0_5 = arith.constant 0 : index
    %c0_6 = arith.constant 0 : index
    %4 = vector.load %arg3[%c0_5, %c0_6] : memref<1x128xf32, #tpu.memory_space<vmem>>, vector<1x128xf32>
    %5 = vector.broadcast %4 : vector<1x128xf32> to vector<2048x128xf32>
    %6 = arith.mulf %3, %5 : vector<2048x128xf32>
    %c0_7 = arith.constant 0 : index
    %c0_8 = arith.constant 0 : index
    %7 = vector.load %arg4[%c0_7, %c0_8] : memref<1x128xf32, #tpu.memory_space<vmem>>, vector<1x128xf32>
    %8 = vector.broadcast %7 : vector<1x128xf32> to vector<2048x128xf32>
    %9 = arith.addf %6, %8 : vector<2048x128xf32>
    %cst_9 = arith.constant 0.000000e+00 : f32
    %10 = vector.broadcast %cst_9 : f32 to vector<2048x128xf32>
    %11 = arith.maximumf %9, %10 : vector<2048x128xf32>
    %12 = vector.shape_cast %11 : vector<2048x128xf32> to vector<8x256x128xf32>
    %cst_10 = arith.constant dense<0.000000e+00> : vector<8x128xf32>
    %13 = vector.multi_reduction <add>, %12, %cst_10 [1] : vector<8x256x128xf32> to vector<8x128xf32>
    %cst_11 = arith.constant 3.906250e-03 : f32
    %14 = vector.broadcast %cst_11 : f32 to vector<8x128xf32>
    %15 = arith.mulf %13, %14 : vector<8x128xf32>
    %16 = arith.truncf %15 : vector<8x128xf32> to vector<8x128xbf16>
    %c0_12 = arith.constant 0 : index
    %c0_13 = arith.constant 0 : index
    %17 = vector.load %arg5[%c0_12, %c0_13] : memref<128x128xbf16, #tpu.memory_space<vmem>>, vector<128x128xbf16>
    %cst_14 = arith.constant dense<0.000000e+00> : vector<8x128xf32>
    %18 = tpu.matmul %16, %17, %cst_14 {dimension_numbers = #tpu.dot_dimension_numbers<[1], [0], [0], [1], [0, 0, 1, 1], [], []>} : vector<8x128xbf16>, vector<128x128xbf16>, vector<8x128xf32> -> vector<8x128xf32>
    %c0_15 = arith.constant 0 : index
    %c0_16 = arith.constant 0 : index
    %19 = vector.load %arg6[%c0_15, %c0_16] : memref<1x128xf32, #tpu.memory_space<vmem>>, vector<1x128xf32>
    %20 = vector.broadcast %19 : vector<1x128xf32> to vector<8x128xf32>
    %21 = arith.addf %18, %20 : vector<8x128xf32>
    %c0_17 = arith.constant 0 : index
    %c0_18 = arith.constant 0 : index
    %22 = vector.load %arg7[%c0_17, %c0_18] : memref<8x128xf32, #tpu.memory_space<vmem>>, vector<8x128xf32>
    tpu.vector_store %arg7[%c0_17, %c0_18], %21 {strides = array<i32>} : memref<8x128xf32, #tpu.memory_space<vmem>>, vector<8x128xf32>,
    return
  }
  func.func @transform_0(%arg0: i32) -> (i32, i32, i32, i32) {
    %c0_i32 = arith.constant 0 : i32
    %c0_i32_0 = arith.constant 0 : i32
    %c0_i32_1 = arith.constant 0 : i32
    %c0_i32_2 = arith.constant 0 : i32
    return %arg0, %c0_i32, %c0_i32_0, %c0_i32_1 : i32, i32, i32, i32
  }
  func.func @transform_1(%arg0: i32) -> (i32, i32) {
    %c0_i32 = arith.constant 0 : i32
    %c0_i32_0 = arith.constant 0 : i32
    %c0_i32_1 = arith.constant 0 : i32
    return %c0_i32, %c0_i32_0 : i32, i32
  }
  func.func @transform_2(%arg0: i32) -> (i32, i32) {
    %c0_i32 = arith.constant 0 : i32
    %c0_i32_0 = arith.constant 0 : i32
    %c0_i32_1 = arith.constant 0 : i32
    return %c0_i32, %c0_i32_0 : i32, i32
  }
  func.func @transform_3(%arg0: i32) -> (i32, i32) {
    %c0_i32 = arith.constant 0 : i32
    %c0_i32_0 = arith.constant 0 : i32
    %c0_i32_1 = arith.constant 0 : i32
    return %c0_i32, %c0_i32_0 : i32, i32
  }
  func.func @transform_4(%arg0: i32) -> (i32, i32) {
    %c0_i32 = arith.constant 0 : i32
    %c0_i32_0 = arith.constant 0 : i32
    %c0_i32_1 = arith.constant 0 : i32
    return %c0_i32, %c0_i32_0 : i32, i32
  }
  func.func @transform_5(%arg0: i32) -> (i32, i32) {
    %c0_i32 = arith.constant 0 : i32
    %c0_i32_0 = arith.constant 0 : i32
    %c0_i32_1 = arith.constant 0 : i32
    return %c0_i32, %c0_i32_0 : i32, i32
  }
  func.func @transform_6(%arg0: i32) -> (i32, i32) {
    %c0_i32 = arith.constant 0 : i32
    %c0_i32_0 = arith.constant 0 : i32
    return %arg0, %c0_i32 : i32, i32
  }
}

</mosaic_0001>

<bundles_post_ra>
// kernel: tpu_custom_call.1
= control target key start
LH: loop header
LB: loop body
LE: loop exit
PB: predicated region body
PF: predicated region fallthrough
CT: control target
= control target key end

     0   :  { %11 = vsyncpa [#allocation3], 0  ;;  %s5701_s0 = inlined_call_operand.hbm [shape: bf16[8,16,16,27], index: 0, kind: input, shape index: {}]   ;;  %s5702_s1 = inlined_call_operand.hbm [shape: bf16[27,128], index: 1, kind: input, shape index: {}]   ;;  %s5703_s2 = inlined_call_operand.vmem [shape: f32[1,128], index: 2, kind: input, shape index: {}]   ;;  %s5704_s3 = inlined_call_operand.vmem [shape: f32[1,128], index: 3, kind: input, shape index: {}]   ;;  %s5705_s4 = inlined_call_operand.hbm [shape: bf16[128,128], index: 4, kind: input, shape index: {}]   ;;  %s5706_s5 = inlined_call_operand.vmem [shape: f32[1,128], index: 5, kind: input, shape index: {}]   ;;  %s5707_s6 = inlined_call_operand.hbm [shape: f32[8,128], index: 6, kind: output, shape index: {}]  }
   0x1   :  { %12 = vsyncpa [#allocation6], 0 }
   0x2   :  { %13 = vsyncpa [#allocation4], 0  ;;  %s4617_s21 = smov [#allocation5]   ;;  %s4618_s23 = smov [#allocation2]  }
   0x3   :  { %s31_s22 = sshll.u32 %s4617_s21, 4  ;;  %s19_s24 = sshll.u32 %s4618_s23, 4  ;;  %s32_s22 = int_to_ptr.vmem [resolvable:$true] %s31_s22  ;;  %s4661_s24 = int_to_ptr.vmem [resolvable:$true] %s19_s24 }
   0x4   :  { %s4523_s27 = scalar_lea.hbm %s5702_s1, 256 }
   0x5   :  { %p4524_p0 = scmp.ne.s32.totalorder %s5702_s1, %s4523_s27  ;;  %p4527_p1 = scmp.lt.u32.totalorder %s4523_s27, %s5702_s1 }
   0x7   :  { %p4529_p2 = pnand %p4527_p1, %p4524_p0 }
   0x9   :  { %4532 = shalt.err (!%p4529_p2)
}
   0xa   :  { %s4533_s8 = scalar_lea.vmem %s32_s22, 256  ;;  %p4538_p4 = scmp.lt.s32.totalorder %s32_s22, %s32_s22 }
   0xb   :  { %p4534_p3 = scmp.ne.s32.totalorder %s32_s22, %s4533_s8  ;;  %p4539_p5 = scmp.lt.s32.totalorder %s4533_s8, %s4533_s8 }
   0xd   :  { %p4540_p6 = por %p4539_p5, %p4538_p4 }
   0xf   :  { %p4541_p7 = pnand %p4540_p6, %p4534_p3 }
  0x11   :  { %4544 = shalt.err (!%p4541_p7)
}
  0x12   :  { %s4619_s9 = smov 64   ;;  %s4620_s10 = smov 4  }
  0x13   :  { %37 = dma.hbm_to_vmem [thread:$0]  %s5702_s1, 256, %s32_s22, [#allocation6], %s4619_s9, %s4619_s9, %s4620_s10  }
  0x14   :  { %s4545_s15 = scalar_lea.hbm %s5701_s0, 16384 }
  0x15   :  { %p4546_p8 = scmp.ne.s32.totalorder %s5701_s0, %s4545_s15  ;;  %p4549_p9 = scmp.lt.u32.totalorder %s4545_s15, %s5701_s0 }
  0x17   :  { %p4551_p10 = pnand %p4549_p9, %p4546_p8 }
  0x19   :  { %4554 = shalt.err (!%p4551_p10)
}
  0x1a   :  { %s4555_s20 = scalar_lea.vmem %s4661_s24, 16384  ;;  %p4560_p12 = scmp.lt.s32.totalorder %s4661_s24, %s4661_s24 }
  0x1b   :  { %p4556_p11 = scmp.ne.s32.totalorder %s4661_s24, %s4555_s20  ;;  %p4561_p13 = scmp.lt.s32.totalorder %s4555_s20, %s4555_s20 }
  0x1d   :  { %p4562_p0 = por %p4561_p13, %p4560_p12 }
  0x1f   :  { %p4563_p1 = pnand %p4562_p0, %p4556_p11 }
  0x21   :  { %4566 = shalt.err (!%p4563_p1)
}
  0x22   :  { %25 = dma.hbm_to_vmem [thread:$0]  %s5701_s0, 16384, %s4661_s24, [#allocation3], %s4619_s9, %s4619_s9, %s4620_s10  }
  0x23   :  { %s4621_s22 = smov [#allocation7]   ;;  %s4567_s27 = scalar_lea.hbm %s5705_s4, 1024 }
  0x24   :  { %s47_s23 = sshll.u32 %s4621_s22, 4  ;;  %p4568_p2 = scmp.ne.s32.totalorder %s5705_s4, %s4567_s27  ;;  %s48_s23 = int_to_ptr.vmem [resolvable:$true] %s47_s23 }
  0x25   :  { %p4571_p3 = scmp.lt.u32.totalorder %s4567_s27, %s5705_s4 }
  0x27   :  { %p4573_p4 = pnand %p4571_p3, %p4568_p2 }
  0x29   :  { %4576 = shalt.err (!%p4573_p4)
}
  0x2a   :  { %s4577_s8 = scalar_lea.vmem %s48_s23, 1024  ;;  %p4582_p6 = scmp.lt.s32.totalorder %s48_s23, %s48_s23 }
  0x2b   :  { %p4578_p5 = scmp.ne.s32.totalorder %s48_s23, %s4577_s8  ;;  %p4583_p7 = scmp.lt.s32.totalorder %s4577_s8, %s4577_s8 }
  0x2d   :  { %p4584_p8 = por %p4583_p7, %p4582_p6 }
  0x2f   :  { %p4585_p9 = pnand %p4584_p8, %p4578_p5 }
  0x31   :  { %4588 = shalt.err (!%p4585_p9)
}
  0x32   :  { %53 = dma.hbm_to_vmem [thread:$0]  %s5705_s4, 1024, %s48_s23, [#allocation6], %s4619_s9, %s4619_s9, %s4620_s10  }
  0x33   :  { %4611 = dma.done.wait [#allocation3], 16384  }
  0x34   :  { %4612 = vsyncadd [#allocation3], 4294950912 }
  0x35   :  { %4613 = dma.done.wait [#allocation6], 1280  }
  0x36   :  { %4614 = vsyncadd [#allocation6], 4294966016  ;;  %vm1362_vm0 = vcmask 1044480   ;;  %vm1363_vm1 = vcmask 1045504   ;;  %v4622_v0 = vmov 65535   ;;  %vm977_vm2 = vcmask 220160  }
  0x37   :  { %v1364_v1 = vsel %vm1362_vm0, 4294967295, %v4622_v0  ;;  %v4381_v2 = vld [vmem:[#allocation5] sm:$0xff]   ;;  %v4382_v4 = vld [vmem:[#allocation5 + $0x8] sm:$0x3f]   ;;  %v4385_v8 = vld [vmem:[#allocation2 + $0x10] sm:$0xff]   ;;  %vm3559_vm3 = vcmask 1041409  }
  0x38   :  { %v1365_v3 = vsel %vm1363_vm1, %v1364_v1, 0  ;;  %4088 = vmatprep.subr.bf16.mxu0 %v4381_v2  ;;  %v4383_v5 = vld [vmem:[#allocation2] sm:$0xff]   ;;  %4368 = vmatprep.subr.bf16.mxu1 %v4381_v2  ;;  %v4384_v7 = vld [vmem:[#allocation2 + $0x8] sm:$0xff]   ;;  %v4386_v9 = vld [vmem:[#allocation2 + $0x18] sm:$0xff]   ;;  %vm3561_vm4 = vcmask 1042434   ;;  %vm4624_vm5 = vmmov 0  }
  0x39   :  { %4089 = vmatpush3.bf16.msra.mxu0 %v4381_v2  ;;  %v1367_v6 = vand.u32 %v4382_v4, %v1365_v3  ;;  %4370 = vmatpush3.bf16.msra.mxu1 %v4381_v2  ;;  %v4387_v10 = vld [vmem:[#allocation2 + $0x20] sm:$0xff]   ;;  %v4399_v11 = vld [vmem:[#allocation2 + $0x210] sm:$0xff]   ;;  %v4400_v12 = vld [vmem:[#allocation2 + $0x218] sm:$0xff]   ;;  %vm3563_vm6 = vcmask 1043459   ;;  %vm3565_vm7 = vcmask 1044484   ;;  %vm3567_vm8 = vcmask 1045509  }
  0x3a   :  { %4092 = vmatprep.mubr.msk.bf16.mxu0 %vm977_vm2, %v4383_v5  ;;  %4224 = vmatprep.mubr.msk.bf16.mxu1 %vm977_vm2, %v4399_v11  ;;  %v4388_v13 = vld [vmem:[#allocation2 + $0x28] sm:$0xff]   ;;  %v4403_v14 = vld [vmem:[#allocation2 + $0x220] sm:$0xff]   ;;  %v4389_v15 = vld [vmem:[#allocation2 + $0x30] sm:$0xff]   ;;  %vm3569_vm9 = vcmask 1046534   ;;  %vm3571_vm10 = vcmask 1047559   ;;  %s4625_s20 = smov [#allocation8]  }
  0x3b   :  { %4090 = vmatprep.subr.bf16.mxu0 %v1367_v6  ;;  %4369 = vmatprep.subr.bf16.mxu1 %v1367_v6  ;;  %v4404_v16 = vld [vmem:[#allocation2 + $0x228] sm:$0xff]   ;;  %v4407_v17 = vld [vmem:[#allocation2 + $0x230] sm:$0xff]   ;;  %v4390_v18 = vld [vmem:[#allocation2 + $0x38] sm:$0xff]   ;;  %s3670_s1 = sshll.u32 %s4625_s20, 4  ;;  %s3671_s1 = int_to_ptr.vmem [resolvable:$true] %s3670_s1 }
  0x3c   :  { %v4391_v19 = vld [vmem:[#allocation2 + $0x40] sm:$0xff]   ;;  %v4408_v20 = vld [vmem:[#allocation2 + $0x238] sm:$0xff]   ;;  %v4392_v22 = vld [vmem:[#allocation2 + $0x48] sm:$0xff]   ;;  %s4589_s21 = scalar_lea.vmem %s3671_s1, 128  ;;  %p4594_p11 = scmp.lt.s32.totalorder %s3671_s1, %s3671_s1 }
  0x3d   :  { %4091 = vmatpush3.bf16.msra.mxu0 %v1367_v6  ;;  %4371 = vmatpush3.bf16.msra.mxu1 %v1367_v6  ;;  %v4411_v21 = vld [vmem:[#allocation2 + $0x240] sm:$0xff]   ;;  %v4393_v23 = vld [vmem:[#allocation2 + $0x50] sm:$0xff]   ;;  %v4412_v24 = vld [vmem:[#allocation2 + $0x248] sm:$0xff]   ;;  %p4590_p10 = scmp.ne.s32.totalorder %s3671_s1, %s4589_s21  ;;  %p4595_p12 = scmp.lt.s32.totalorder %s4589_s21, %s4589_s21 }
  0x3e   :  { %v4415_v25 = vld [vmem:[#allocation2 + $0x250] sm:$0xff]   ;;  %v4394_v26 = vld [vmem:[#allocation2 + $0x58] sm:$0xff]   ;;  %v4395_v27 = vld [vmem:[#allocation2 + $0x60] sm:$0xff]  }
  0x3f   :  { %v4416_v28 = vld [vmem:[#allocation2 + $0x258] sm:$0xff]   ;;  %v4419_v29 = vld [vmem:[#allocation2 + $0x260] sm:$0xff]   ;;  %v4396_v30 = vld [vmem:[#allocation2 + $0x68] sm:$0xff]   ;;  %p4596_p13 = por %p4595_p12, %p4594_p11 }
  0x40   :  { %4093 = vmatmul.mubr.msk.bf16.vlgmr.msra.gmra.mrb[0].mxu0 %vm977_vm2, %v4384_v7  ;;  %4225 = vmatmul.mubr.msk.bf16.vlgmr.msra.gmra.mrb[0].mxu1 %vm977_vm2, %v4400_v12  ;;  %v4397_v31 = vld [vmem:[#allocation2 + $0x70] sm:$0xff]   ;;  %v4420_v32 = vld [vmem:[#allocation2 + $0x268] sm:$0xff]   ;;  %v4398_v34 = vld [vmem:[#allocation2 + $0x78] sm:$0xff]  }
  0x41   :  { %4096 = vmatprep.mubr.msk.bf16.mxu0 %vm977_vm2, %v4385_v8  ;;  %4228 = vmatprep.mubr.msk.bf16.mxu1 %vm977_vm2, %v4403_v14  ;;  %v4423_v33 = vld [vmem:[#allocation2 + $0x270] sm:$0xff]   ;;  %v4401_v35 = vld [vmem:[#allocation2 + $0x80] sm:$0xff]   ;;  %v4424_v36 = vld [vmem:[#allocation2 + $0x278] sm:$0xff]   ;;  %p4597_p0 = pnand %p4596_p13, %p4590_p10 }
  0x42   :  { %v4427_v37 = vld [vmem:[#allocation2 + $0x280] sm:$0xff]   ;;  %v4402_v38 = vld [vmem:[#allocation2 + $0x88] sm:$0xff]   ;;  %v4405_v39 = vld [vmem:[#allocation2 + $0x90] sm:$0xff]  }
  0x43   :  { %v4428_v40 = vld [vmem:[#allocation2 + $0x288] sm:$0xff]   ;;  %v4431_v41 = vld [vmem:[#allocation2 + $0x290] sm:$0xff]   ;;  %v4406_v42 = vld [vmem:[#allocation2 + $0x98] sm:$0xff]  }
  0x44   :  { %v4409_v43 = vld [vmem:[#allocation2 + $0xa0] sm:$0xff]   ;;  %v4432_v44 = vld [vmem:[#allocation2 + $0x298] sm:$0xff]   ;;  %v4410_v46 = vld [vmem:[#allocation2 + $0xa8] sm:$0xff]  }
  0x45   :  { %v4435_v45 = vld [vmem:[#allocation2 + $0x2a0] sm:$0xff]   ;;  %v4413_v47 = vld [vmem:[#allocation2 + $0xb0] sm:$0xff]   ;;  %v4436_v48 = vld [vmem:[#allocation2 + $0x2a8] sm:$0xff]  }
  0x46   :  { %v4439_v49 = vld [vmem:[#allocation2 + $0x2b0] sm:$0xff]   ;;  %v4414_v50 = vld [vmem:[#allocation2 + $0xb8] sm:$0xff]   ;;  %v4417_v51 = vld [vmem:[#allocation2 + $0xc0] sm:$0xff]  }
  0x47   :  { %v4440_v52 = vld [vmem:[#allocation2 + $0x2b8] sm:$0xff]   ;;  %v4443_v53 = vld [vmem:[#allocation2 + $0x2c0] sm:$0xff]   ;;  %v4418_v54 = vld [vmem:[#allocation2 + $0xc8] sm:$0xff]  }
  0x48   :  { %4097 = vmatmul.mubr.msk.bf16.gmra.mrb[4].mxu0 %vm977_vm2, %v4386_v9  ;;  %4229 = vmatmul.mubr.msk.bf16.gmra.mrb[4].mxu1 %vm977_vm2, %v4404_v16  ;;  %v4421_v55 = vld [vmem:[#allocation2 + $0xd0] sm:$0xff]   ;;  %v4444_v56 = vld [vmem:[#allocation2 + $0x2c8] sm:$0xff]   ;;  %v4422_v58 = vld [vmem:[#allocation2 + $0xd8] sm:$0xff]  }
  0x49   :  { %4100 = vmatprep.mubr.msk.bf16.mxu0 %vm977_vm2, %v4387_v10  ;;  %4232 = vmatprep.mubr.msk.bf16.mxu1 %vm977_vm2, %v4407_v17  ;;  %v4447_v57 = vld [vmem:[#allocation2 + $0x2d0] sm:$0xff]   ;;  %v4425_v59 = vld [vmem:[#allocation2 + $0xe0] sm:$0xff]   ;;  %v4448_v60 = vld [vmem:[#allocation2 + $0x2d8] sm:$0xff]  }
  0x4a   :  { %v4451_v61 = vld [vmem:[#allocation2 + $0x2e0] sm:$0xff]   ;;  %v4426_v62 = vld [vmem:[#allocation2 + $0xe8] sm:$0xff]   ;;  %v4429_v63 = vld [vmem:[#allocation2 + $0xf0] sm:$0xff]  }
  0x4b   :  { %v4452_v0 = vld [vmem:[#allocation2 + $0x2e8] sm:$0xff]   ;;  %v4455_v1 = vld [vmem:[#allocation2 + $0x2f0] sm:$0xff]   ;;  %v4430_v2 = vld [vmem:[#allocation2 + $0xf8] sm:$0xff]  }
  0x4c   :  { %v4433_v3 = vld [vmem:[#allocation2 + $0x100] sm:$0xff]   ;;  %v4456_v4 = vld [vmem:[#allocation2 + $0x2f8] sm:$0xff]   ;;  %v4434_v6 = vld [vmem:[#allocation2 + $0x108] sm:$0xff]  }
  0x4d   :  { %v4459_v5 = vld [vmem:[#allocation2 + $0x300] sm:$0xff]   ;;  %v4437_v7 = vld [vmem:[#allocation2 + $0x110] sm:$0xff]   ;;  %v4460_v8 = vld [vmem:[#allocation2 + $0x308] sm:$0xff]  }
  0x4e   :  { %v4463_v9 = vld [vmem:[#allocation2 + $0x310] sm:$0xff]   ;;  %v4438_v10 = vld [vmem:[#allocation2 + $0x118] sm:$0xff]   ;;  %v4441_v11 = vld [vmem:[#allocation2 + $0x120] sm:$0xff]  }
  0x4f   :  { %v4464_v12 = vld [vmem:[#allocation2 + $0x318] sm:$0xff]   ;;  %v4442_v14 = vld [vmem:[#allocation2 + $0x128] sm:$0xff]   ;;  %v4471_v17 = vld [vmem:[#allocation2 + $0x330] sm:$0xff]  }
  0x50   :  { %4101 = vmatmul.mubr.msk.bf16.gmra.mrb[8].mxu0 %vm977_vm2, %v4388_v13  ;;  %4233 = vmatmul.mubr.msk.bf16.gmra.mrb[8].mxu1 %vm977_vm2, %v4408_v20  ;;  %v4467_v13 = vld [vmem:[#allocation2 + $0x320] sm:$0xff]   ;;  %v4468_v16 = vld [vmem:[#allocation2 + $0x328] sm:$0xff]   ;;  %v4472_v20 = vld [vmem:[#allocation2 + $0x338] sm:$0xff]  }
  0x51   :  { %4104 = vmatprep.mubr.msk.bf16.mxu0 %vm977_vm2, %v4389_v15  ;;  %4236 = vmatprep.mubr.msk.bf16.mxu1 %vm977_vm2, %v4411_v21  ;;  %v4445_v15 = vld [vmem:[#allocation2 + $0x130] sm:$0xff]   ;;  %v4475_v21 = vld [vmem:[#allocation2 + $0x340] sm:$0xff]  }
  0x58   :  { %4105 = vmatmul.mubr.msk.bf16.gmra.mrb[12].mxu0 %vm977_vm2, %v4390_v18  ;;  %4237 = vmatmul.mubr.msk.bf16.gmra.mrb[12].mxu1 %vm977_vm2, %v4412_v24  ;;  %v4446_v18 = vld [vmem:[#allocation2 + $0x138] sm:$0xff]   ;;  %v4476_v24 = vld [vmem:[#allocation2 + $0x348] sm:$0xff]  }
  0x59   :  { %4108 = vmatprep.mubr.msk.bf16.mxu0 %vm977_vm2, %v4391_v19  ;;  %4240 = vmatprep.mubr.msk.bf16.mxu1 %vm977_vm2, %v4415_v25  ;;  %v4449_v19 = vld [vmem:[#allocation2 + $0x140] sm:$0xff]   ;;  %v4479_v25 = vld [vmem:[#allocation2 + $0x350] sm:$0xff]  }
  0x60   :  { %4109 = vmatmul.mubr.msk.bf16.gmra.mrb[16].mxu0 %vm977_vm2, %v4392_v22  ;;  %4241 = vmatmul.mubr.msk.bf16.gmra.mrb[16].mxu1 %vm977_vm2, %v4416_v28  ;;  %v4450_v22 = vld [vmem:[#allocation2 + $0x148] sm:$0xff]   ;;  %v4480_v28 = vld [vmem:[#allocation2 + $0x358] sm:$0xff]  }
  0x61   :  { %4112 = vmatprep.mubr.msk.bf16.mxu0 %vm977_vm2, %v4393_v23  ;;  %4244 = vmatprep.mubr.msk.bf16.mxu1 %vm977_vm2, %v4419_v29  ;;  %v4453_v23 = vld [vmem:[#allocation2 + $0x150] sm:$0xff]   ;;  %v4483_v29 = vld [vmem:[#allocation2 + $0x360] sm:$0xff]  }
  0x68   :  { %4113 = vmatmul.mubr.msk.bf16.gmra.mrb[20].mxu0 %vm977_vm2, %v4394_v26  ;;  %4245 = vmatmul.mubr.msk.bf16.gmra.mrb[20].mxu1 %vm977_vm2, %v4420_v32  ;;  %v4454_v26 = vld [vmem:[#allocation2 + $0x158] sm:$0xff]   ;;  %v4484_v32 = vld [vmem:[#allocation2 + $0x368] sm:$0xff]  }
  0x69   :  { %4116 = vmatprep.mubr.msk.bf16.mxu0 %vm977_vm2, %v4395_v27  ;;  %4248 = vmatprep.mubr.msk.bf16.mxu1 %vm977_vm2, %v4423_v33  ;;  %v4457_v27 = vld [vmem:[#allocation2 + $0x160] sm:$0xff]   ;;  %v4487_v33 = vld [vmem:[#allocation2 + $0x370] sm:$0xff]  }
  0x70   :  { %4117 = vmatmul.mubr.msk.bf16.gmra.mrb[24].mxu0 %vm977_vm2, %v4396_v30  ;;  %4249 = vmatmul.mubr.msk.bf16.gmra.mrb[24].mxu1 %vm977_vm2, %v4424_v36  ;;  %v4458_v30 = vld [vmem:[#allocation2 + $0x168] sm:$0xff]   ;;  %v4488_v36 = vld [vmem:[#allocation2 + $0x378] sm:$0xff]  }
  0x71   :  { %4120 = vmatprep.mubr.msk.bf16.mxu0 %vm977_vm2, %v4397_v31  ;;  %4252 = vmatprep.mubr.msk.bf16.mxu1 %vm977_vm2, %v4427_v37  ;;  %v4461_v31 = vld [vmem:[#allocation2 + $0x170] sm:$0xff]   ;;  %v4491_v37 = vld [vmem:[#allocation2 + $0x380] sm:$0xff]  }
  0x78   :  { %4121 = vmatmul.mubr.msk.bf16.gmra.mrb[28].mxu0 %vm977_vm2, %v4398_v34  ;;  %4253 = vmatmul.mubr.msk.bf16.gmra.mrb[28].mxu1 %vm977_vm2, %v4428_v40  ;;  %v4462_v34 = vld [vmem:[#allocation2 + $0x178] sm:$0xff]   ;;  %v4492_v40 = vld [vmem:[#allocation2 + $0x388] sm:$0xff]  }
  0x79   :  { %4124 = vmatprep.mubr.msk.bf16.mxu0 %vm977_vm2, %v4401_v35  ;;  %4256 = vmatprep.mubr.msk.bf16.mxu1 %vm977_vm2, %v4431_v41  ;;  %v4465_v35 = vld [vmem:[#allocation2 + $0x180] sm:$0xff]   ;;  %v4495_v41 = vld [vmem:[#allocation2 + $0x390] sm:$0xff]  }
  0x80   :  { %4125 = vmatmul.mubr.msk.bf16.gmra.mrb[32].mxu0 %vm977_vm2, %v4402_v38  ;;  %4257 = vmatmul.mubr.msk.bf16.gmra.mrb[32].mxu1 %vm977_vm2, %v4432_v44  ;;  %v4466_v38 = vld [vmem:[#allocation2 + $0x188] sm:$0xff]   ;;  %v4470_v44 = vld [vmem:[#allocation2 + $0x198] sm:$0xff]  }
  0x81   :  { %4128 = vmatprep.mubr.msk.bf16.mxu0 %vm977_vm2, %v4405_v39  ;;  %4260 = vmatprep.mubr.msk.bf16.mxu1 %vm977_vm2, %v4435_v45  ;;  %v4469_v39 = vld [vmem:[#allocation2 + $0x190] sm:$0xff]   ;;  %v4473_v45 = vld [vmem:[#allocation2 + $0x1a0] sm:$0xff]  }
  0x88   :  { %4129 = vmatmul.mubr.msk.bf16.gmra.mrb[36].mxu0 %vm977_vm2, %v4406_v42  ;;  %4261 = vmatmul.mubr.msk.bf16.gmra.mrb[36].mxu1 %vm977_vm2, %v4436_v48  ;;  %v5708_v42 = vmov 0.0   ;;  %v4474_v48 = vld [vmem:[#allocation2 + $0x1a8] sm:$0xff]  }
  0x89   :  { %4132 = vmatprep.mubr.msk.bf16.mxu0 %vm977_vm2, %v4409_v43  ;;  %4264 = vmatprep.mubr.msk.bf16.mxu1 %vm977_vm2, %v4439_v49  ;;  %v4511_v43 = vld [vmem:[#allocation7] sm:$0xff]  }
  0x8a   :  { %4348 = vmatprep.subr.bf16.mxu1 %v5708_v42  ;;  %v4477_v49 = vld [vmem:[#allocation2 + $0x1b0] sm:$0xff]  }
  0x8b   :  { %4349 = vmatpush3.bf16.msra.mxu1 %v4511_v43 }
  0x8c   :  { %4350 = vmatprep.subr.bf16.mxu1 %v5708_v42 }
  0x90   :  { %4133 = vmatmul.mubr.msk.bf16.gmra.mrb[40].mxu0 %vm977_vm2, %v4410_v46  ;;  %4265 = vmatmul.mubr.msk.bf16.gmra.mrb[40].mxu1 %vm977_vm2, %v4440_v52  ;;  %v4496_v46 = vld [vmem:[#allocation2 + $0x398] sm:$0xff]   ;;  %v4824_v52 = vld [vmem:[%s5703_s2] ss:$0 sm:$0xff] }
  0x91   :  { %4136 = vmatprep.mubr.msk.bf16.mxu0 %vm977_vm2, %v4413_v47  ;;  %4268 = vmatprep.mubr.msk.bf16.mxu1 %vm977_vm2, %v4443_v53  ;;  %v4499_v47 = vld [vmem:[#allocation2 + $0x3a0] sm:$0xff]  }
  0x98   :  { %4137 = vmatmul.mubr.msk.bf16.gmra.mrb[44].mxu0 %vm977_vm2, %v4414_v50  ;;  %4269 = vmatmul.mubr.msk.bf16.gmra.mrb[44].mxu1 %vm977_vm2, %v4444_v56  ;;  %v4500_v50 = vld [vmem:[#allocation2 + $0x3a8] sm:$0xff]   ;;  %v4478_v56 = vld [vmem:[#allocation2 + $0x1b8] sm:$0xff]  }
  0x99   :  { %4140 = vmatprep.mubr.msk.bf16.mxu0 %vm977_vm2, %v4417_v51  ;;  %4272 = vmatprep.mubr.msk.bf16.mxu1 %vm977_vm2, %v4447_v57  ;;  %v4501_v51 = vld [vmem:[#allocation2 + $0x3b0] sm:$0xff]  }
  0xa0   :  { %4141 = vmatmul.mubr.msk.bf16.gmra.mrb[48].mxu0 %vm977_vm2, %v4418_v54  ;;  %4273 = vmatmul.mubr.msk.bf16.gmra.mrb[48].mxu1 %vm977_vm2, %v4448_v60  ;;  %v4830_v54 = vld [vmem:[%s5704_s3] ss:$0 sm:$0xff] }
  0xa1   :  { %4144 = vmatprep.mubr.msk.bf16.mxu0 %vm977_vm2, %v4421_v55  ;;  %4276 = vmatprep.mubr.msk.bf16.mxu1 %vm977_vm2, %v4451_v61  ;;  %v4481_v60 = vld [vmem:[#allocation2 + $0x1c0] sm:$0xff]  }
  0xa8   :  { %4145 = vmatmul.mubr.msk.bf16.gmra.mrb[52].mxu0 %vm977_vm2, %v4422_v58  ;;  %4277 = vmatmul.mubr.msk.bf16.gmra.mrb[52].mxu1 %vm977_vm2, %v4452_v0 }
  0xa9   :  { %4148 = vmatprep.mubr.msk.bf16.mxu0 %vm977_vm2, %v4425_v59  ;;  %4280 = vmatprep.mubr.msk.bf16.mxu1 %vm977_vm2, %v4455_v1  ;;  %v4502_v1 = vld [vmem:[#allocation2 + $0x3b8] sm:$0xff]  }
  0xb0   :  { %4149 = vmatmul.mubr.msk.bf16.gmra.mrb[56].mxu0 %vm977_vm2, %v4426_v62  ;;  %4281 = vmatmul.mubr.msk.bf16.gmra.mrb[56].mxu1 %vm977_vm2, %v4456_v4 }
  0xb1   :  { %4152 = vmatprep.mubr.msk.bf16.mxu0 %vm977_vm2, %v4429_v63  ;;  %4284 = vmatprep.mubr.msk.bf16.mxu1 %vm977_vm2, %v4459_v5 }
  0xb8   :  { %4153 = vmatmul.mubr.msk.bf16.gmra.mrb[60].mxu0 %vm977_vm2, %v4430_v2  ;;  %4285 = vmatmul.mubr.msk.bf16.gmra.mrb[60].mxu1 %vm977_vm2, %v4460_v8  ;;  %v4503_v2 = vld [vmem:[#allocation2 + $0x3c0] sm:$0xff]  }
  0xb9   :  { %4156 = vmatprep.mubr.msk.bf16.mxu0 %vm977_vm2, %v4433_v3  ;;  %4288 = vmatprep.mubr.msk.bf16.mxu1 %vm977_vm2, %v4463_v9 }
  0xc0   :  { %4157 = vmatmul.mubr.msk.bf16.gmra.mrb[64].mxu0 %vm977_vm2, %v4434_v6  ;;  %4289 = vmatmul.mubr.msk.bf16.gmra.mrb[64].mxu1 %vm977_vm2, %v4464_v12 }
  0xc1   :  { %4160 = vmatprep.mubr.msk.bf16.mxu0 %vm977_vm2, %v4437_v7  ;;  %4292 = vmatprep.mubr.msk.bf16.mxu1 %vm977_vm2, %v4467_v13 }
  0xc8   :  { %4161 = vmatmul.mubr.msk.bf16.gmra.mrb[68].mxu0 %vm977_vm2, %v4438_v10  ;;  %4293 = vmatmul.mubr.msk.bf16.gmra.mrb[68].mxu1 %vm977_vm2, %v4468_v16  ;;  %v4482_v10 = vld [vmem:[#allocation2 + $0x1c8] sm:$0xff]   ;;  %v4485_v16 = vld [vmem:[#allocation2 + $0x1d0] sm:$0xff]  }
  0xc9   :  { %4164 = vmatprep.mubr.msk.bf16.mxu0 %vm977_vm2, %v4441_v11  ;;  %4296 = vmatprep.mubr.msk.bf16.mxu1 %vm977_vm2, %v4471_v17 }
  0xd0   :  { %4165 = vmatmul.mubr.msk.bf16.gmra.mrb[72].mxu0 %vm977_vm2, %v4442_v14  ;;  %4297 = vmatmul.mubr.msk.bf16.gmra.mrb[72].mxu1 %vm977_vm2, %v4472_v20 }
  0xd1   :  { %4168 = vmatprep.mubr.msk.bf16.mxu0 %vm977_vm2, %v4445_v15  ;;  %4300 = vmatprep.mubr.msk.bf16.mxu1 %vm977_vm2, %v4475_v21 }
  0xd8   :  { %4169 = vmatmul.mubr.msk.bf16.gmra.mrb[76].mxu0 %vm977_vm2, %v4446_v18  ;;  %4301 = vmatmul.mubr.msk.bf16.gmra.mrb[76].mxu1 %vm977_vm2, %v4476_v24  ;;  %v4504_v24 = vld [vmem:[#allocation2 + $0x3c8] sm:$0xff]  }
  0xd9   :  { %4172 = vmatprep.mubr.msk.bf16.mxu0 %vm977_vm2, %v4449_v19  ;;  %4304 = vmatprep.mubr.msk.bf16.mxu1 %vm977_vm2, %v4479_v25 }
  0xe0   :  { %4173 = vmatmul.mubr.msk.bf16.gmra.mrb[80].mxu0 %vm977_vm2, %v4450_v22  ;;  %4305 = vmatmul.mubr.msk.bf16.gmra.mrb[80].mxu1 %vm977_vm2, %v4480_v28 }
  0xe1   :  { %4176 = vmatprep.mubr.msk.bf16.mxu0 %vm977_vm2, %v4453_v23  ;;  %4308 = vmatprep.mubr.msk.bf16.mxu1 %vm977_vm2, %v4483_v29 }
  0xe8   :  { %4177 = vmatmul.mubr.msk.bf16.gmra.mrb[84].mxu0 %vm977_vm2, %v4454_v26  ;;  %4309 = vmatmul.mubr.msk.bf16.gmra.mrb[84].mxu1 %vm977_vm2, %v4484_v32 }
  0xe9   :  { %4180 = vmatprep.mubr.msk.bf16.mxu0 %vm977_vm2, %v4457_v27  ;;  %4312 = vmatprep.mubr.msk.bf16.mxu1 %vm977_vm2, %v4487_v33  ;;  %v4505_v27 = vld [vmem:[#allocation2 + $0x3d0] sm:$0xff]  }
  0xf0   :  { %4181 = vmatmul.mubr.msk.bf16.gmra.mrb[88].mxu0 %vm977_vm2, %v4458_v30  ;;  %4313 = vmatmul.mubr.msk.bf16.gmra.mrb[88].mxu1 %vm977_vm2, %v4488_v36 }
  0xf1   :  { %4184 = vmatprep.mubr.msk.bf16.mxu0 %vm977_vm2, %v4461_v31  ;;  %4316 = vmatprep.mubr.msk.bf16.mxu1 %vm977_vm2, %v4491_v37 }
  0xf8   :  { %4185 = vmatmul.mubr.msk.bf16.gmra.mrb[92].mxu0 %vm977_vm2, %v4462_v34  ;;  %4317 = vmatmul.mubr.msk.bf16.gmra.mrb[92].mxu1 %vm977_vm2, %v4492_v40 }
  0xf9   :  { %4188 = vmatprep.mubr.msk.bf16.mxu0 %vm977_vm2, %v4465_v35  ;;  %4320 = vmatprep.mubr.msk.bf16.mxu1 %vm977_vm2, %v4495_v41 }
 0x100   :  { %4189 = vmatmul.mubr.msk.bf16.gmra.mrb[96].mxu0 %vm977_vm2, %v4466_v38  ;;  %4321 = vmatmul.mubr.msk.bf16.gmra.mrb[96].mxu1 %vm977_vm2, %v4496_v46  ;;  %v4486_v38 = vld [vmem:[#allocation2 + $0x1d8] sm:$0xff]  }
 0x101   :  { %4192 = vmatprep.mubr.msk.bf16.mxu0 %vm977_vm2, %v4469_v39  ;;  %4324 = vmatprep.mubr.msk.bf16.mxu1 %vm977_vm2, %v4499_v47 }
 0x108   :  { %4193 = vmatmul.mubr.msk.bf16.gmra.mrb[100].mxu0 %vm977_vm2, %v4470_v44  ;;  %4325 = vmatmul.mubr.msk.bf16.gmra.mrb[100].mxu1 %vm977_vm2, %v4500_v50 }
 0x109   :  { %4196 = vmatprep.mubr.msk.bf16.mxu0 %vm977_vm2, %v4473_v45  ;;  %4328 = vmatprep.mubr.msk.bf16.mxu1 %vm977_vm2, %v4501_v51  ;;  %v4489_v45 = vld [vmem:[#allocation2 + $0x1e0] sm:$0xff]  }
 0x110   :  { %4197 = vmatmul.mubr.msk.bf16.gmra.mrb[104].mxu0 %vm977_vm2, %v4474_v48  ;;  %4329 = vmatmul.mubr.msk.bf16.gmra.mrb[104].mxu1 %vm977_vm2, %v4502_v1 }
 0x111   :  { %4200 = vmatprep.mubr.msk.bf16.mxu0 %vm977_vm2, %v4477_v49  ;;  %4332 = vmatprep.mubr.msk.bf16.mxu1 %vm977_vm2, %v4503_v2 }
 0x113   :  { %v4094_v53 = vpop.f32.mrb[0].mxu0  ;;  %v4848_v19 = vpop.f32.mrb[0].mxu1 }
 0x114   :  { %v1403_v55 = vpop.f32.mrb[1].mxu0  ;;  %v2435_v57 = vmul.f32 %v4094_v53, %v4824_v52  ;;  %v4852_v25 = vpop.f32.mrb[1].mxu1 }
 0x115   :  { %v2433_v58 = vmul.f32 %v4824_v52, %v1403_v55  ;;  %v4095_v59 = vpop.f32.mrb[2].mxu0  ;;  %v4855_v26 = vpop.f32.mrb[2].mxu1  ;;  %v4506_v55 = vld [vmem:[#allocation2 + $0x3d8] sm:$0xff]  }
 0x116   :  { %v1406_v61 = vpop.f32.mrb[3].mxu0  ;;  %v2436_v63 = vmul.f32 %v4095_v59, %v4824_v52  ;;  %v2698_v3 = vadd.f32 %v4830_v54, %v2435_v57  ;;  %v4860_v32 = vpop.f32.mrb[3].mxu1 }
 0x117   :  { %v2696_v62 = vadd.f32 %v4830_v54, %v2433_v58  ;;  %v2434_v0 = vmul.f32 %v4824_v52, %v1406_v61  ;;  %v4507_v58 = vld [vmem:[#allocation2 + $0x3e0] sm:$0xff]  }
 0x118   :  { %4201 = vmatmul.mubr.msk.bf16.gmra.mrb[108].mxu0 %vm977_vm2, %v4478_v56  ;;  %v2699_v6 = vadd.f32 %v4830_v54, %v2436_v63  ;;  %v2954_v11 = vmax.f32 %v2698_v3, 0.0  ;;  %4333 = vmatmul.mubr.msk.bf16.gmra.mrb[108].mxu1 %vm977_vm2, %v4504_v24  ;;  %v4509_v24 = vld [vmem:[#allocation2 + $0x3f0] sm:$0xff]  }
 0x119   :  { %v2697_v4 = vadd.f32 %v4830_v54, %v2434_v0  ;;  %4204 = vmatprep.mubr.msk.bf16.mxu0 %vm977_vm2, %v4481_v60  ;;  %v2952_v5 = vmax.f32 %v2696_v62, 0.0  ;;  %4336 = vmatprep.mubr.msk.bf16.mxu1 %vm977_vm2, %v4505_v27 }
 0x11a   :  { %v2955_v20 = vmax.f32 %v2699_v6, 0.0 }
 0x11b   :  { %v2953_v7 = vmax.f32 %v2697_v4, 0.0  ;;  %v4098_v8 = vpop.f32.mrb[4].mxu0  ;;  %v4867_v48 = vpop.f32.mrb[4].mxu1 }
 0x11c   :  { %v1419_v9 = vpop.f32.mrb[5].mxu0  ;;  %v2439_v13 = vmul.f32 %v4098_v8, %v4824_v52  ;;  %v4872_v56 = vpop.f32.mrb[5].mxu1 }
 0x11d   :  { %v3208_v12 = vadd.f32 %v2953_v7, %v2952_v5  ;;  %v2437_v14 = vmul.f32 %v4824_v52, %v1419_v9  ;;  %v4099_v15 = vpop.f32.mrb[6].mxu0  ;;  %v4875_v57 = vpop.f32.mrb[6].mxu1  ;;  %v4490_v5 = vld [vmem:[#allocation2 + $0x1e8] sm:$0xff]  }
 0x11e   :  { %v2440_v17 = vmul.f32 %v4099_v15, %v4824_v52  ;;  %v1422_v18 = vpop.f32.mrb[7].mxu0  ;;  %v2702_v28 = vadd.f32 %v4830_v54, %v2439_v13  ;;  %v4880_v63 = vpop.f32.mrb[7].mxu1 }
 0x11f   :  { %v3209_v21 = vadd.f32 %v3208_v12, %v2954_v11  ;;  %v2700_v22 = vadd.f32 %v4830_v54, %v2437_v14  ;;  %v2438_v23 = vmul.f32 %v4824_v52, %v1422_v18  ;;  %v4493_v11 = vld [vmem:[#allocation2 + $0x1f0] sm:$0xff]   ;;  %v4512_v12 = vld [vmem:[#allocation7 + $0x8] sm:$0xff]  }
 0x120   :  { %4205 = vmatmul.mubr.msk.bf16.gmra.mrb[112].mxu0 %vm977_vm2, %v4482_v10  ;;  %v2703_v33 = vadd.f32 %v4830_v54, %v2440_v17  ;;  %v2958_v39 = vmax.f32 %v2702_v28, 0.0  ;;  %4337 = vmatmul.mubr.msk.bf16.gmra.mrb[112].mxu1 %vm977_vm2, %v4506_v55 }
 0x121   :  { %v2956_v29 = vmax.f32 %v2700_v22, 0.0  ;;  %v3210_v30 = vadd.f32 %v3209_v21, %v2955_v20  ;;  %v2701_v31 = vadd.f32 %v4830_v54, %v2438_v23  ;;  %4208 = vmatprep.mubr.msk.bf16.mxu0 %vm977_vm2, %v4485_v16  ;;  %4340 = vmatprep.mubr.msk.bf16.mxu1 %vm977_vm2, %v4507_v58  ;;  %v4508_v21 = vld [vmem:[#allocation2 + $0x3e8] sm:$0xff]   ;;  %v4510_v58 = vld [vmem:[#allocation2 + $0x3f8] sm:$0xff]  }
 0x122   :  { %v2959_v46 = vmax.f32 %v2703_v33, 0.0  ;;  %4351 = vmatpush3.bf16.msra.mxu1 %v4512_v12 }
 0x123   :  { %v3211_v34 = vadd.f32 %v3210_v30, %v2956_v29  ;;  %v2957_v35 = vmax.f32 %v2701_v31, 0.0  ;;  %v4102_v36 = vpop.f32.mrb[8].mxu0  ;;  %v4888_v15 = vpop.f32.mrb[8].mxu1  ;;  %4352 = vmatprep.subr.bf16.mxu1 %v5708_v42 }
 0x124   :  { %v1435_v37 = vpop.f32.mrb[9].mxu0  ;;  %v2443_v41 = vmul.f32 %v4102_v36, %v4824_v52  ;;  %v4892_v22 = vpop.f32.mrb[9].mxu1 }
 0x125   :  { %v3212_v40 = vadd.f32 %v3211_v34, %v2957_v35  ;;  %v2441_v43 = vmul.f32 %v4824_v52, %v1435_v37  ;;  %v4103_v44 = vpop.f32.mrb[10].mxu0  ;;  %v4895_v23 = vpop.f32.mrb[10].mxu1 }
 0x126   :  { %v1438_v47 = vpop.f32.mrb[11].mxu0  ;;  %v2444_v51 = vmul.f32 %v4103_v44, %v4824_v52  ;;  %v2706_v59 = vadd.f32 %v4830_v54, %v2443_v41  ;;  %v4901_v31 = vpop.f32.mrb[11].mxu1 }
 0x127   :  { %v3213_v49 = vadd.f32 %v3212_v40, %v2958_v39  ;;  %v2704_v50 = vadd.f32 %v4830_v54, %v2441_v43  ;;  %v2442_v53 = vmul.f32 %v4824_v52, %v1438_v47 }
 0x128   :  { %4209 = vmatmul.mubr.msk.bf16.gmra.mrb[116].mxu0 %vm977_vm2, %v4486_v38  ;;  %v2707_v1 = vadd.f32 %v4830_v54, %v2444_v51  ;;  %v2962_v6 = vmax.f32 %v2706_v59, 0.0  ;;  %4341 = vmatmul.mubr.msk.bf16.gmra.mrb[116].mxu1 %vm977_vm2, %v4508_v21  ;;  %v4494_v38 = vld [vmem:[#allocation2 + $0x1f8] sm:$0xff]  }
 0x129   :  { %v2960_v60 = vmax.f32 %v2704_v50, 0.0  ;;  %v3214_v61 = vadd.f32 %v3213_v49, %v2959_v46  ;;  %v2705_v62 = vadd.f32 %v4830_v54, %v2442_v53  ;;  %4212 = vmatprep.mubr.msk.bf16.mxu0 %vm977_vm2, %v4489_v45  ;;  %4344 = vmatprep.mubr.msk.bf16.mxu1 %vm977_vm2, %v4509_v24  ;;  %v4497_v45 = vld [vmem:[#allocation2 + $0x200] sm:$0xff]  }
 0x12a   :  { %v2963_v16 = vmax.f32 %v2707_v1, 0.0 }
 0x12b   :  { %v3215_v0 = vadd.f32 %v3214_v61, %v2960_v60  ;;  %v2961_v2 = vmax.f32 %v2705_v62, 0.0  ;;  %v4106_v3 = vpop.f32.mrb[12].mxu0  ;;  %v4908_v49 = vpop.f32.mrb[12].mxu1 }
 0x12c   :  { %v1451_v4 = vpop.f32.mrb[13].mxu0  ;;  %v2447_v8 = vmul.f32 %v4106_v3, %v4824_v52  ;;  %v4913_v59 = vpop.f32.mrb[13].mxu1 }
 0x12d   :  { %v3216_v7 = vadd.f32 %v3215_v0, %v2961_v2  ;;  %v2445_v9 = vmul.f32 %v4824_v52, %v1451_v4  ;;  %v4107_v10 = vpop.f32.mrb[14].mxu0  ;;  %v4916_v60 = vpop.f32.mrb[14].mxu1 }
 0x12e   :  { %v2448_v13 = vmul.f32 %v4107_v10, %v4824_v52  ;;  %v1454_v14 = vpop.f32.mrb[15].mxu0  ;;  %v2710_v27 = vadd.f32 %v4830_v54, %v2447_v8  ;;  %v4921_v2 = vpop.f32.mrb[15].mxu1  ;;  %v4498_v8 = vld [vmem:[#allocation2 + $0x208] sm:$0xff]  }
 0x12f   :  { %v3217_v17 = vadd.f32 %v3216_v7, %v2962_v6  ;;  %v2708_v18 = vadd.f32 %v4830_v54, %v2445_v9  ;;  %v2446_v20 = vmul.f32 %v4824_v52, %v1454_v14 }
 0x130   :  { %4213 = vmatmul.mubr.msk.bf16.gmra.mrb[120].mxu0 %vm977_vm2, %v4490_v5  ;;  %v2711_v33 = vadd.f32 %v4830_v54, %v2448_v13  ;;  %v2966_v39 = vmax.f32 %v2710_v27, 0.0  ;;  %4345 = vmatmul.mubr.msk.bf16.gmra.mrb[120].mxu1 %vm977_vm2, %v4510_v58 }
 0x131   :  { %v2964_v28 = vmax.f32 %v2708_v18, 0.0  ;;  %v3218_v29 = vadd.f32 %v3217_v17, %v2963_v16  ;;  %v2709_v30 = vadd.f32 %v4830_v54, %v2446_v20  ;;  %4216 = vmatprep.mubr.msk.bf16.mxu0 %vm977_vm2, %v4493_v11 }
 0x132   :  { %v2967_v46 = vmax.f32 %v2711_v33, 0.0 }
 0x133   :  { %v3219_v34 = vadd.f32 %v3218_v29, %v2964_v28  ;;  %v2965_v35 = vmax.f32 %v2709_v30, 0.0  ;;  %v4110_v36 = vpop.f32.mrb[16].mxu0  ;;  %v4928_v17 = vpop.f32.mrb[16].mxu1  ;;  %v4513_v28 = vld [vmem:[#allocation7 + $0x10] sm:$0xff]  }
 0x134   :  { %v1467_v37 = vpop.f32.mrb[17].mxu0  ;;  %v2451_v41 = vmul.f32 %v4110_v36, %v4824_v52  ;;  %v4932_v27 = vpop.f32.mrb[17].mxu1  ;;  %4353 = vmatpush3.bf16.msra.mxu1 %v4513_v28 }
 0x135   :  { %v3220_v40 = vadd.f32 %v3219_v34, %v2965_v35  ;;  %v2449_v43 = vmul.f32 %v4824_v52, %v1467_v37  ;;  %v4111_v44 = vpop.f32.mrb[18].mxu0  ;;  %v4935_v29 = vpop.f32.mrb[18].mxu1  ;;  %4354 = vmatprep.subr.bf16.mxu1 %v5708_v42 }
 0x136   :  { %v1470_v47 = vpop.f32.mrb[19].mxu0  ;;  %v2452_v53 = vmul.f32 %v4111_v44, %v4824_v52  ;;  %v2714_v61 = vadd.f32 %v4830_v54, %v2451_v41  ;;  %v4939_v36 = vpop.f32.mrb[19].mxu1 }
 0x137   :  { %v3221_v50 = vadd.f32 %v3220_v40, %v2966_v39  ;;  %v2712_v51 = vadd.f32 %v4830_v54, %v2449_v43  ;;  %v2450_v55 = vmul.f32 %v4824_v52, %v1470_v47 }
 0x138   :  { %4217 = vmatmul.mubr.msk.bf16.gmra.mrb[124].mxu0 %vm977_vm2, %v4494_v38  ;;  %v2715_v4 = vadd.f32 %v4830_v54, %v2452_v53  ;;  %v2970_v9 = vmax.f32 %v2714_v61, 0.0 }
 0x139   :  { %v2968_v62 = vmax.f32 %v2712_v51, 0.0  ;;  %v3222_v0 = vadd.f32 %v3221_v50, %v2967_v46  ;;  %v2713_v1 = vadd.f32 %v4830_v54, %v2450_v55  ;;  %4220 = vmatprep.mubr.msk.bf16.mxu0 %vm977_vm2, %v4497_v45 }
 0x13a   :  { %v2971_v18 = vmax.f32 %v2715_v4, 0.0 }
 0x13b   :  { %v3223_v3 = vadd.f32 %v3222_v0, %v2968_v62  ;;  %v2969_v5 = vmax.f32 %v2713_v1, 0.0  ;;  %v4114_v6 = vpop.f32.mrb[20].mxu0  ;;  %v4945_v53 = vpop.f32.mrb[20].mxu1 }
 0x13c   :  { %v1483_v7 = vpop.f32.mrb[21].mxu0  ;;  %v2455_v11 = vmul.f32 %v4114_v6, %v4824_v52  ;;  %5712 = vst [vmem:[#allocation12_spill] sm:$0xff] %v4945_v53  ;;  %v4950_v0 = vpop.f32.mrb[21].mxu1 }
 0x13d   :  { %v3224_v10 = vadd.f32 %v3223_v3, %v2969_v5  ;;  %v2453_v12 = vmul.f32 %v4824_v52, %v1483_v7  ;;  %v4115_v13 = vpop.f32.mrb[22].mxu0  ;;  %v4952_v1 = vpop.f32.mrb[22].mxu1 }
 0x13e   :  { %v2456_v14 = vmul.f32 %v4115_v13, %v4824_v52  ;;  %v1486_v16 = vpop.f32.mrb[23].mxu0  ;;  %v2718_v30 = vadd.f32 %v4830_v54, %v2455_v11  ;;  %5713 = vst [vmem:[#allocation13_spill] sm:$0xff] %v4952_v1  ;;  %v4956_v7 = vpop.f32.mrb[23].mxu1 }
 0x13f   :  { %v3225_v20 = vadd.f32 %v3224_v10, %v2970_v9  ;;  %v2716_v21 = vadd.f32 %v4830_v54, %v2453_v12  ;;  %v2454_v24 = vmul.f32 %v4824_v52, %v1486_v16 }
 0x140   :  { %4221 = vmatmul.mubr.msk.bf16.gmra.mrb[128].mxu0 %vm977_vm2, %v4498_v8  ;;  %v2719_v37 = vadd.f32 %v4830_v54, %v2456_v14  ;;  %v2974_v43 = vmax.f32 %v2718_v30, 0.0 }
 0x141   :  { %v2972_v33 = vmax.f32 %v2716_v21, 0.0  ;;  %v3226_v34 = vadd.f32 %v3225_v20, %v2971_v18  ;;  %v2717_v35 = vadd.f32 %v4830_v54, %v2454_v24 }
 0x142   :  { %v2975_v50 = vmax.f32 %v2719_v37, 0.0 }
 0x143   :  { %v3227_v38 = vadd.f32 %v3226_v34, %v2972_v33  ;;  %v2973_v39 = vmax.f32 %v2717_v35, 0.0  ;;  %v4118_v40 = vpop.f32.mrb[24].mxu0  ;;  %v4962_v28 = vpop.f32.mrb[24].mxu1 }
 0x144   :  { %v1499_v41 = vpop.f32.mrb[25].mxu0  ;;  %v2459_v45 = vmul.f32 %v4118_v40, %v4824_v52  ;;  %5714 = vst [vmem:[#allocation14_spill] sm:$0xff] %v4962_v28  ;;  %v4966_v37 = vpop.f32.mrb[25].mxu1 }
 0x145   :  { %v3228_v44 = vadd.f32 %v3227_v38, %v2973_v39  ;;  %v2457_v46 = vmul.f32 %v4824_v52, %v1499_v41  ;;  %v4119_v47 = vpop.f32.mrb[26].mxu0  ;;  %5715 = vst [vmem:[#allocation15_spill] sm:$0xff] %v4966_v37  ;;  %v4968_v38 = vpop.f32.mrb[26].mxu1 }
 0x146   :  { %v1502_v51 = vpop.f32.mrb[27].mxu0  ;;  %v2460_v61 = vmul.f32 %v4119_v47, %v4824_v52  ;;  %v2722_v3 = vadd.f32 %v4830_v54, %v2459_v45  ;;  %5716 = vst [vmem:[#allocation16_spill] sm:$0xff] %v4968_v38 }
 0x147   :  { %v3229_v55 = vadd.f32 %v3228_v44, %v2974_v43  ;;  %v2720_v58 = vadd.f32 %v4830_v54, %v2457_v46  ;;  %v2458_v62 = vmul.f32 %v4824_v52, %v1502_v51  ;;  %v4972_v44 = vpop.f32.mrb[27].mxu1 }
 0x148   :  { %v2723_v9 = vadd.f32 %v4830_v54, %v2460_v61  ;;  %v2978_v13 = vmax.f32 %v2722_v3, 0.0  ;;  %5717 = vst [vmem:[#allocation17_spill] sm:$0xff] %v4972_v44 }
 0x149   :  { %v2976_v4 = vmax.f32 %v2720_v58, 0.0  ;;  %v3230_v5 = vadd.f32 %v3229_v55, %v2975_v50  ;;  %v2721_v6 = vadd.f32 %v4830_v54, %v2458_v62 }
 0x14a   :  { %v2979_v30 = vmax.f32 %v2723_v9, 0.0 }
 0x14b   :  { %v3231_v8 = vadd.f32 %v3230_v5, %v2976_v4  ;;  %v2977_v10 = vmax.f32 %v2721_v6, 0.0  ;;  %v4122_v11 = vpop.f32.mrb[28].mxu0 }
 0x14c   :  { %v1515_v12 = vpop.f32.mrb[29].mxu0  ;;  %v2463_v16 = vmul.f32 %v4122_v11, %v4824_v52 }
 0x14d   :  { %v3232_v14 = vadd.f32 %v3231_v8, %v2977_v10  ;;  %v2461_v18 = vmul.f32 %v4824_v52, %v1515_v12  ;;  %v4123_v20 = vpop.f32.mrb[30].mxu0  ;;  %v4254_v8 = vpop.f32.mrb[28].mxu1 }
 0x14e   :  { %v2464_v21 = vmul.f32 %v4123_v20, %v4824_v52  ;;  %v1518_v24 = vpop.f32.mrb[31].mxu0  ;;  %v2726_v39 = vadd.f32 %v4830_v54, %v2463_v16  ;;  %v2595_v12 = vmul.f32 %v4254_v8, %v4824_v52 }
 0x14f   :  { %v3233_v33 = vadd.f32 %v3232_v14, %v2978_v13  ;;  %v2724_v34 = vadd.f32 %v4830_v54, %v2461_v18  ;;  %v2462_v35 = vmul.f32 %v4824_v52, %v1518_v24  ;;  %v2043_v13 = vpop.f32.mrb[29].mxu1 }
 0x150   :  { %v2727_v45 = vadd.f32 %v4830_v54, %v2464_v21  ;;  %v2982_v58 = vmax.f32 %v2726_v39, 0.0  ;;  %v2593_v16 = vmul.f32 %v4824_v52, %v2043_v13  ;;  %v4255_v18 = vpop.f32.mrb[30].mxu1 }
 0x151   :  { %v2980_v40 = vmax.f32 %v2724_v34, 0.0  ;;  %v3234_v41 = vadd.f32 %v3233_v33, %v2979_v30  ;;  %v2725_v43 = vadd.f32 %v4830_v54, %v2462_v35  ;;  %v2046_v30 = vpop.f32.mrb[31].mxu1  ;;  %v2858_v33 = vadd.f32 %v4830_v54, %v2595_v12 }
 0x152   :  { %v2983_v4 = vmax.f32 %v2727_v45, 0.0  ;;  %v2856_v34 = vadd.f32 %v4830_v54, %v2593_v16  ;;  %v2596_v35 = vmul.f32 %v4255_v18, %v4824_v52  ;;  %v2594_v39 = vmul.f32 %v4824_v52, %v2046_v30 }
 0x153   :  { %v3235_v46 = vadd.f32 %v3234_v41, %v2980_v40  ;;  %v2981_v47 = vmax.f32 %v2725_v43, 0.0  ;;  %v4126_v50 = vpop.f32.mrb[32].mxu0 }
 0x154   :  { %v2467_v51 = vmul.f32 %v4126_v50, %v4824_v52  ;;  %v1531_v55 = vpop.f32.mrb[33].mxu0  ;;  %v3112_v50 = vmax.f32 %v2856_v34, 0.0 }
 0x155   :  { %v3236_v61 = vadd.f32 %v3235_v46, %v2981_v47  ;;  %v2465_v62 = vmul.f32 %v4824_v52, %v1531_v55  ;;  %v4127_v3 = vpop.f32.mrb[34].mxu0  ;;  %v2857_v55 = vadd.f32 %v4830_v54, %v2594_v39 }
 0x156   :  { %v2468_v5 = vmul.f32 %v4127_v3, %v4824_v52  ;;  %v1534_v6 = vpop.f32.mrb[35].mxu0  ;;  %v2730_v14 = vadd.f32 %v4830_v54, %v2467_v51  ;;  %v2859_v51 = vadd.f32 %v4830_v54, %v2596_v35 }
 0x157   :  { %v3237_v9 = vadd.f32 %v3236_v61, %v2982_v58  ;;  %v2728_v10 = vadd.f32 %v4830_v54, %v2465_v62  ;;  %v2466_v11 = vmul.f32 %v4824_v52, %v1534_v6 }
 0x158   :  { %v2731_v21 = vadd.f32 %v4830_v54, %v2468_v5  ;;  %v2986_v46 = vmax.f32 %v2730_v14, 0.0 }
 0x159   :  { %v3238_v20 = vadd.f32 %v3237_v9, %v2983_v4  ;;  %v2729_v24 = vadd.f32 %v4830_v54, %v2466_v11  ;;  %v2984_v41 = vmax.f32 %v2728_v10, 0.0  ;;  %v3114_v9 = vmax.f32 %v2858_v33, 0.0  ;;  %v4258_v11 = vpop.f32.mrb[32].mxu1 }
 0x15a   :  { %v2987_v5 = vmax.f32 %v2731_v21, 0.0  ;;  %v3113_v10 = vmax.f32 %v2857_v55, 0.0  ;;  %v2059_v18 = vpop.f32.mrb[33].mxu1  ;;  %v2599_v30 = vmul.f32 %v4258_v11, %v4824_v52 }
 0x15b   :  { %v3239_v40 = vrot.slane %v3238_v20, 4  ;;  %v2985_v43 = vmax.f32 %v2729_v24, 0.0  ;;  %v4130_v45 = vpop.f32.mrb[36].mxu0  ;;  %v4259_v34 = vpop.f32.mrb[34].mxu1 }
 0x15c   :  { %v1547_v47 = vpop.f32.mrb[37].mxu0  ;;  %v2471_v62 = vmul.f32 %v4130_v45, %v4824_v52  ;;  %v3393_v24 = vadd.f32 %v3113_v10, %v3112_v50  ;;  %v2597_v45 = vmul.f32 %v4824_v52, %v2059_v18 }
 0x15d   :  { %v3240_v58 = vadd.f32 %v3239_v40, %v3238_v20  ;;  %v3245_v61 = vadd.f32 %v2985_v43, %v2984_v41  ;;  %v2469_v3 = vmul.f32 %v4824_v52, %v1547_v47  ;;  %v4131_v4 = vpop.f32.mrb[38].mxu0  ;;  %v3115_v20 = vmax.f32 %v2859_v51, 0.0  ;;  %v2062_v40 = vpop.f32.mrb[35].mxu1 }
 0x15e   :  { %v2472_v6 = vmul.f32 %v4131_v4, %v4824_v52  ;;  %v1550_v8 = vpop.f32.mrb[39].mxu0  ;;  %v2734_v21 = vadd.f32 %v4830_v54, %v2471_v62  ;;  %v3394_v43 = vadd.f32 %v3393_v24, %v3114_v9  ;;  %v2860_v62 = vadd.f32 %v4830_v54, %v2597_v45 }
 0x15f   :  { %v3241_v12 = vrot.slane %v3240_v58, 2  ;;  %v3246_v13 = vadd.f32 %v3245_v61, %v2986_v46  ;;  %v2732_v14 = vadd.f32 %v4830_v54, %v2469_v3  ;;  %v2470_v16 = vmul.f32 %v4824_v52, %v1550_v8 }
 0x160   :  { %v2735_v41 = vadd.f32 %v4830_v54, %v2472_v6  ;;  %v5002_v61 = vadd.f32 %v4830_v54, %v2599_v30  ;;  %v3395_v3 = vadd.f32 %v3394_v43, %v3115_v20  ;;  %v2600_v4 = vmul.f32 %v4259_v34, %v4824_v52 }
 0x161   :  { %v2988_v35 = vmax.f32 %v2732_v14, 0.0  ;;  %v3247_v39 = vadd.f32 %v3246_v13, %v2987_v5  ;;  %v2733_v33 = vadd.f32 %v4830_v54, %v2470_v16  ;;  %v3242_v46 = vadd.f32 %v3241_v12, %v3240_v58  ;;  %v4262_v16 = vpop.f32.mrb[36].mxu1 }
 0x162   :  { %v2990_v5 = vmax.f32 %v2734_v21, 0.0  ;;  %v2991_v58 = vmax.f32 %v2735_v41, 0.0  ;;  %v3116_v13 = vmax.f32 %v2860_v62, 0.0  ;;  %v2598_v14 = vmul.f32 %v4824_v52, %v2062_v40  ;;  %v2075_v34 = vpop.f32.mrb[37].mxu1 }
 0x163   :  { %v3248_v47 = vadd.f32 %v3247_v39, %v2988_v35  ;;  %v2989_v55 = vmax.f32 %v2733_v33, 0.0  ;;  %v4134_v51 = vpop.f32.mrb[40].mxu0  ;;  %v3243_v18 = vrot.slane %v3242_v46, 1  ;;  %v3118_v21 = vmax.f32 %v5002_v61, 0.0  ;;  %v4263_v33 = vpop.f32.mrb[38].mxu1 }
 0x164   :  { %v1563_v50 = vpop.f32.mrb[41].mxu0  ;;  %v2475_v6 = vmul.f32 %v4134_v51, %v4824_v52  ;;  %v3396_v35 = vadd.f32 %v3395_v3, %v3116_v13  ;;  %v2863_v39 = vadd.f32 %v4830_v54, %v2600_v4  ;;  %v2861_v51 = vadd.f32 %v4830_v54, %v2598_v14 }
 0x165   :  { %v3249_v8 = vadd.f32 %v3248_v47, %v2989_v55  ;;  %v2473_v9 = vmul.f32 %v4824_v52, %v1563_v50  ;;  %v4135_v10 = vpop.f32.mrb[42].mxu0  ;;  %v2078_v47 = vpop.f32.mrb[39].mxu1  ;;  %v2603_v50 = vmul.f32 %v4262_v16, %v4824_v52  ;;  %v2601_v62 = vmul.f32 %v4824_v52, %v2075_v34 }
 0x166   :  { %v2476_v11 = vmul.f32 %v4135_v10, %v4824_v52  ;;  %v1566_v12 = vpop.f32.mrb[43].mxu0  ;;  %v2738_v41 = vadd.f32 %v4830_v54, %v2475_v6  ;;  %v5020_v61 = vadd.f32 %v3243_v18, %v3242_v46  ;;  %v3117_v10 = vmax.f32 %v2861_v51, 0.0  ;;  %v4514_v18 = vld [vmem:[#allocation7 + $0x18] sm:$0xff]  }
 0x167   :  { %v3250_v24 = vadd.f32 %v3249_v8, %v2990_v5  ;;  %v2736_v20 = vadd.f32 %v4830_v54, %v2473_v9  ;;  %v2474_v30 = vmul.f32 %v4824_v52, %v1566_v12  ;;  %v2604_v8 = vmul.f32 %v4263_v33, %v4824_v52  ;;  %4355 = vmatpush3.bf16.msra.mxu1 %v4514_v18 }
 0x168   :  { %v2739_v55 = vadd.f32 %v4830_v54, %v2476_v11  ;;  %v2864_v11 = vadd.f32 %v4830_v54, %v2601_v62  ;;  %v2994_v12 = vmax.f32 %v2738_v41, 0.0  ;;  %v2602_v16 = vmul.f32 %v4824_v52, %v2078_v47  ;;  %4356 = vmatprep.subr.bf16.mxu1 %v5708_v42 }
 0x169   :  { %v2992_v43 = vmax.f32 %v2736_v20, 0.0  ;;  %v3251_v45 = vadd.f32 %v3250_v24, %v2991_v58  ;;  %v2737_v40 = vadd.f32 %v4830_v54, %v2474_v30  ;;  %v5025_v58 = vadd.f32 %v4830_v54, %v2603_v50 }
 0x16a   :  { %v2995_v24 = vmax.f32 %v2739_v55, 0.0  ;;  %v3119_v34 = vmax.f32 %v2863_v39, 0.0  ;;  %v3397_v33 = vadd.f32 %v3396_v35, %v3117_v10  ;;  %v2867_v41 = vadd.f32 %v4830_v54, %v2604_v8 }
 0x16b   :  { %v3252_v3 = vadd.f32 %v3251_v45, %v2992_v43  ;;  %v2993_v4 = vmax.f32 %v2737_v40, 0.0  ;;  %v4138_v5 = vpop.f32.mrb[44].mxu0  ;;  %v4266_v43 = vpop.f32.mrb[40].mxu1  ;;  %v3122_v55 = vmax.f32 %v5025_v58, 0.0 }
 0x16c   :  { %v2479_v6 = vmul.f32 %v4138_v5, %v4824_v52  ;;  %v1579_v9 = vpop.f32.mrb[45].mxu0  ;;  %v2091_v50 = vpop.f32.mrb[41].mxu1  ;;  %v3398_v47 = vadd.f32 %v3397_v33, %v3118_v21 }
 0x16d   :  { %v3253_v13 = vadd.f32 %v3252_v3, %v2993_v4  ;;  %v2477_v14 = vmul.f32 %v4824_v52, %v1579_v9  ;;  %v4139_v46 = vpop.f32.mrb[46].mxu0  ;;  %v3120_v3 = vmax.f32 %v2864_v11, 0.0  ;;  %v4267_v4 = vpop.f32.mrb[42].mxu1  ;;  %v2865_v9 = vadd.f32 %v4830_v54, %v2602_v16 }
 0x16e   :  { %v2480_v20 = vmul.f32 %v4139_v46, %v4824_v52  ;;  %v1582_v30 = vpop.f32.mrb[47].mxu0  ;;  %v2742_v62 = vadd.f32 %v4830_v54, %v2479_v6  ;;  %v2094_v10 = vpop.f32.mrb[43].mxu1  ;;  %v2605_v21 = vmul.f32 %v4824_v52, %v2091_v50  ;;  %v2608_v46 = vmul.f32 %v4267_v4, %v4824_v52 }
 0x16f   :  { %v3254_v45 = vadd.f32 %v3253_v13, %v2994_v12  ;;  %v2740_v40 = vadd.f32 %v4830_v54, %v2477_v14  ;;  %v2478_v51 = vmul.f32 %v4824_v52, %v1582_v30  ;;  %v3399_v12 = vadd.f32 %v3398_v47, %v3119_v34 }
 0x170   :  { %v2743_v8 = vadd.f32 %v4830_v54, %v2480_v20  ;;  %v2607_v13 = vmul.f32 %v4266_v43, %v4824_v52  ;;  %v3121_v14 = vmax.f32 %v2865_v9, 0.0  ;;  %v2868_v33 = vadd.f32 %v4830_v54, %v2605_v21 }
 0x171   :  { %v2996_v35 = vmax.f32 %v2740_v40, 0.0  ;;  %v3255_v39 = vadd.f32 %v3254_v45, %v2995_v24  ;;  %v2741_v5 = vadd.f32 %v4830_v54, %v2478_v51  ;;  %v3400_v30 = vadd.f32 %v3399_v12, %v3120_v3 }
 0x172   :  { %v2870_v16 = vadd.f32 %v4830_v54, %v2607_v13  ;;  %v2998_v20 = vmax.f32 %v2742_v62, 0.0  ;;  %v2606_v40 = vmul.f32 %v4824_v52, %v2094_v10  ;;  %v2999_v51 = vmax.f32 %v2743_v8, 0.0 }
 0x173   :  { %v3256_v6 = vadd.f32 %v3255_v39, %v2996_v35  ;;  %v2997_v58 = vmax.f32 %v2741_v5, 0.0  ;;  %v4142_v11 = vpop.f32.mrb[48].mxu0  ;;  %v3123_v4 = vmax.f32 %v2867_v41, 0.0  ;;  %v3401_v35 = vadd.f32 %v3400_v30, %v3121_v14  ;;  %v4270_v39 = vpop.f32.mrb[44].mxu1 }
 0x174   :  { %v2483_v18 = vmul.f32 %v4142_v11, %v4824_v52  ;;  %v1595_v24 = vpop.f32.mrb[49].mxu0  ;;  %v2871_v62 = vadd.f32 %v4830_v54, %v2608_v46  ;;  %v2107_v12 = vpop.f32.mrb[45].mxu1  ;;  %v3124_v10 = vmax.f32 %v2868_v33, 0.0  ;;  %v2869_v14 = vadd.f32 %v4830_v54, %v2606_v40 }
 0x175   :  { %v3257_v34 = vadd.f32 %v3256_v6, %v2997_v58  ;;  %v2481_v43 = vmul.f32 %v4824_v52, %v1595_v24  ;;  %v4143_v45 = vpop.f32.mrb[50].mxu0  ;;  %v3402_v21 = vadd.f32 %v3401_v35, %v3122_v55  ;;  %v3126_v6 = vmax.f32 %v2870_v16, 0.0  ;;  %v4271_v8 = vpop.f32.mrb[46].mxu1 }
 0x176   :  { %v2484_v50 = vmul.f32 %v4143_v45, %v4824_v52  ;;  %v1598_v47 = vpop.f32.mrb[51].mxu0  ;;  %v2746_v13 = vadd.f32 %v4830_v54, %v2483_v18  ;;  %v2110_v24 = vpop.f32.mrb[47].mxu1  ;;  %v2609_v46 = vmul.f32 %v4824_v52, %v2107_v12  ;;  %v3125_v16 = vmax.f32 %v2869_v14, 0.0 }
 0x177   :  { %v3258_v5 = vadd.f32 %v3257_v34, %v2998_v20  ;;  %v2744_v3 = vadd.f32 %v4830_v54, %v2481_v43  ;;  %v2482_v9 = vmul.f32 %v4824_v52, %v1598_v47  ;;  %v3403_v20 = vadd.f32 %v3402_v21, %v3123_v4 }
 0x178   :  { %v2747_v30 = vadd.f32 %v4830_v54, %v2484_v50  ;;  %v2611_v34 = vmul.f32 %v4270_v39, %v4824_v52  ;;  %v2612_v33 = vmul.f32 %v4271_v8, %v4824_v52  ;;  %v2872_v50 = vadd.f32 %v4830_v54, %v2609_v46 }
 0x179   :  { %v3000_v58 = vmax.f32 %v2744_v3, 0.0  ;;  %v3259_v11 = vadd.f32 %v3258_v5, %v2999_v51  ;;  %v2745_v41 = vadd.f32 %v4830_v54, %v2482_v9  ;;  %v3404_v47 = vadd.f32 %v3403_v20, %v3124_v10 }
 0x17a   :  { %v5061_v40 = vadd.f32 %v4830_v54, %v2611_v34  ;;  %v3002_v4 = vmax.f32 %v2746_v13, 0.0  ;;  %v2610_v3 = vmul.f32 %v4824_v52, %v2110_v24  ;;  %v3003_v9 = vmax.f32 %v2747_v30, 0.0  ;;  %v4515_v34 = vld [vmem:[#allocation7 + $0x20] sm:$0xff]  }
 0x17b   :  { %v3260_v43 = vadd.f32 %v3259_v11, %v3000_v58  ;;  %v3001_v18 = vmax.f32 %v2745_v41, 0.0  ;;  %v4146_v55 = vpop.f32.mrb[52].mxu0  ;;  %v3127_v8 = vmax.f32 %v2871_v62, 0.0  ;;  %v3405_v58 = vadd.f32 %v3404_v47, %v3125_v16  ;;  %v4274_v11 = vpop.f32.mrb[48].mxu1  ;;  %4357 = vmatpush3.bf16.msra.mxu1 %v4515_v34 }
 0x17c   :  { %v2487_v45 = vmul.f32 %v4146_v55, %v4824_v52  ;;  %v1611_v51 = vpop.f32.mrb[53].mxu0  ;;  %v2875_v13 = vadd.f32 %v4830_v54, %v2612_v33  ;;  %v2123_v20 = vpop.f32.mrb[49].mxu1  ;;  %v3130_v24 = vmax.f32 %v5061_v40, 0.0  ;;  %v3128_v30 = vmax.f32 %v2872_v50, 0.0  ;;  %4358 = vmatprep.subr.bf16.mxu1 %v5708_v42 }
 0x17d   :  { %v3261_v35 = vadd.f32 %v3260_v43, %v3001_v18  ;;  %v2485_v39 = vmul.f32 %v4824_v52, %v1611_v51  ;;  %v4147_v5 = vpop.f32.mrb[54].mxu0  ;;  %v3406_v43 = vadd.f32 %v3405_v58, %v3126_v6  ;;  %v4275_v18 = vpop.f32.mrb[50].mxu1  ;;  %v2873_v51 = vadd.f32 %v4830_v54, %v2610_v3 }
 0x17e   :  { %v2488_v12 = vmul.f32 %v4147_v5, %v4824_v52  ;;  %v1614_v21 = vpop.f32.mrb[55].mxu0  ;;  %v2750_v46 = vadd.f32 %v4830_v54, %v2487_v45  ;;  %v2126_v47 = vpop.f32.mrb[51].mxu1  ;;  %v2613_v45 = vmul.f32 %v4824_v52, %v2123_v20  ;;  %v2616_v5 = vmul.f32 %v4275_v18, %v4824_v52 }
 0x17f   :  { %v3262_v10 = vadd.f32 %v3261_v35, %v3002_v4  ;;  %v2748_v41 = vadd.f32 %v4830_v54, %v2485_v39  ;;  %v2486_v14 = vmul.f32 %v4824_v52, %v1614_v21  ;;  %v3407_v33 = vadd.f32 %v3406_v43, %v3127_v8 }
 0x180   :  { %v2751_v4 = vadd.f32 %v4830_v54, %v2488_v12  ;;  %v2615_v35 = vmul.f32 %v4274_v11, %v4824_v52  ;;  %v3129_v39 = vmax.f32 %v2873_v51, 0.0  ;;  %v2876_v12 = vadd.f32 %v4830_v54, %v2613_v45 }
 0x181   :  { %v3004_v55 = vmax.f32 %v2748_v41, 0.0  ;;  %v3263_v62 = vadd.f32 %v3262_v10, %v3003_v9  ;;  %v2749_v16 = vadd.f32 %v4830_v54, %v2486_v14  ;;  %v3408_v21 = vadd.f32 %v3407_v33, %v3128_v30 }
 0x182   :  { %v2878_v58 = vadd.f32 %v4830_v54, %v2615_v35  ;;  %v3006_v8 = vmax.f32 %v2750_v46, 0.0  ;;  %v2614_v14 = vmul.f32 %v4824_v52, %v2126_v47  ;;  %v3007_v20 = vmax.f32 %v2751_v4, 0.0 }
 0x183   :  { %v3264_v6 = vadd.f32 %v3263_v62, %v3004_v55  ;;  %v3005_v40 = vmax.f32 %v2749_v16, 0.0  ;;  %v4150_v50 = vpop.f32.mrb[56].mxu0  ;;  %v3131_v18 = vmax.f32 %v2875_v13, 0.0  ;;  %v3409_v55 = vadd.f32 %v3408_v21, %v3129_v39  ;;  %v4278_v62 = vpop.f32.mrb[52].mxu1 }
 0x184   :  { %v2491_v9 = vmul.f32 %v4150_v50, %v4824_v52  ;;  %v1627_v3 = vpop.f32.mrb[57].mxu0  ;;  %v2879_v46 = vadd.f32 %v4830_v54, %v2616_v5  ;;  %v2139_v33 = vpop.f32.mrb[53].mxu1  ;;  %v3132_v47 = vmax.f32 %v2876_v12, 0.0  ;;  %v2877_v39 = vadd.f32 %v4830_v54, %v2614_v14 }
 0x185   :  { %v3265_v11 = vadd.f32 %v3264_v6, %v3005_v40  ;;  %v2489_v10 = vmul.f32 %v4824_v52, %v1627_v3  ;;  %v4151_v41 = vpop.f32.mrb[58].mxu0  ;;  %v3410_v45 = vadd.f32 %v3409_v55, %v3130_v24  ;;  %v3134_v6 = vmax.f32 %v2878_v58, 0.0  ;;  %v4279_v4 = vpop.f32.mrb[54].mxu1 }
 0x186   :  { %v2492_v34 = vmul.f32 %v4151_v41, %v4824_v52  ;;  %v1630_v43 = vpop.f32.mrb[59].mxu0  ;;  %v2754_v35 = vadd.f32 %v4830_v54, %v2491_v9  ;;  %v2142_v3 = vpop.f32.mrb[55].mxu1  ;;  %v2617_v5 = vmul.f32 %v4824_v52, %v2139_v33  ;;  %v3133_v58 = vmax.f32 %v2877_v39, 0.0 }
 0x187   :  { %v3266_v16 = vadd.f32 %v3265_v11, %v3006_v8  ;;  %v2752_v30 = vadd.f32 %v4830_v54, %v2489_v10  ;;  %v2490_v51 = vmul.f32 %v4824_v52, %v1630_v43  ;;  %v3411_v8 = vadd.f32 %v3410_v45, %v3131_v18 }
 0x188   :  { %v2755_v21 = vadd.f32 %v4830_v54, %v2492_v34  ;;  %v2619_v11 = vmul.f32 %v4278_v62, %v4824_v52  ;;  %v2620_v12 = vmul.f32 %v4279_v4, %v4824_v52  ;;  %v2880_v55 = vadd.f32 %v4830_v54, %v2617_v5  ;;  %v5101_v62 = vld [vmem:[%s5703_s2] ss:$0 sm:$0xff]  ;;  %v4282_v4 = vpop.f32.mrb[56].mxu1 }
 0x189   :  { %v3008_v40 = vmax.f32 %v2752_v30, 0.0  ;;  %v3267_v50 = vadd.f32 %v3266_v16, %v3007_v20  ;;  %v2753_v13 = vadd.f32 %v4830_v54, %v2490_v51  ;;  %v3412_v43 = vadd.f32 %v3411_v8, %v3132_v47 }
 0x18a   :  { %v2882_v14 = vadd.f32 %v4830_v54, %v2619_v11  ;;  %v3010_v34 = vmax.f32 %v2754_v35, 0.0  ;;  %v2618_v51 = vmul.f32 %v5101_v62, %v2142_v3  ;;  %v3011_v33 = vmax.f32 %v2755_v21, 0.0  ;;  %v2155_v3 = vpop.f32.mrb[57].mxu1 }
 0x18b   :  { %v3268_v10 = vadd.f32 %v3267_v50, %v3008_v40  ;;  %v3009_v9 = vmax.f32 %v2753_v13, 0.0  ;;  %v4154_v24 = vpop.f32.mrb[60].mxu0  ;;  %v3135_v45 = vmax.f32 %v2879_v46, 0.0  ;;  %v3413_v47 = vadd.f32 %v3412_v43, %v3133_v58 }
 0x18c   :  { %v2495_v41 = vmul.f32 %v4154_v24, %v4824_v52  ;;  %v1643_v20 = vpop.f32.mrb[61].mxu0  ;;  %v5108_v52 = vld [vmem:[%s5704_s3] ss:$0 sm:$0xff]  ;;  %v3138_v8 = vmax.f32 %v2882_v14, 0.0  ;;  %v3136_v11 = vmax.f32 %v2880_v55, 0.0 }
 0x18d   :  { %v3269_v18 = vadd.f32 %v3268_v10, %v3009_v9  ;;  %v2493_v16 = vmul.f32 %v5101_v62, %v1643_v20  ;;  %v4155_v30 = vpop.f32.mrb[62].mxu0  ;;  %v3414_v21 = vadd.f32 %v3413_v47, %v3134_v6  ;;  %v2883_v5 = vadd.f32 %v5108_v52, %v2620_v12  ;;  %v4283_v10 = vpop.f32.mrb[58].mxu1 }
 0x18e   :  { %v2758_v54 = vadd.f32 %v5108_v52, %v2495_v41  ;;  %v1646_v35 = vpop.f32.mrb[63].mxu0  ;;  %v2496_v13 = vmul.f32 %v5101_v62, %v4155_v30  ;;  %v2881_v58 = vadd.f32 %v5108_v52, %v2618_v51  ;;  %v2158_v41 = vpop.f32.mrb[59].mxu1 }
 0x18f   :  { %v3270_v40 = vadd.f32 %v3269_v18, %v3010_v34  ;;  %v2756_v50 = vadd.f32 %v5108_v52, %v2493_v16  ;;  %v2494_v39 = vmul.f32 %v5101_v62, %v1646_v35  ;;  %v3415_v43 = vadd.f32 %v3414_v21, %v3135_v45 }
 0x190   :  { %v3014_v20 = vmax.f32 %v2758_v54, 0.0  ;;  %v2623_v34 = vmul.f32 %v5101_v62, %v4282_v4  ;;  %v2621_v18 = vmul.f32 %v5101_v62, %v2155_v3  ;;  %v2759_v6 = vadd.f32 %v5108_v52, %v2496_v13 }
 0x191   :  { %v3012_v9 = vmax.f32 %v2756_v50, 0.0  ;;  %v3271_v24 = vadd.f32 %v3270_v40, %v3011_v33  ;;  %v2757_v46 = vadd.f32 %v5108_v52, %v2494_v39  ;;  %v3137_v12 = vmax.f32 %v2881_v58, 0.0 }
 0x192   :  { %v3416_v35 = vadd.f32 %v3415_v43, %v3136_v11  ;;  %v3139_v47 = vmax.f32 %v2883_v5, 0.0  ;;  %v2884_v51 = vadd.f32 %v5108_v52, %v2621_v18  ;;  %v2624_v4 = vmul.f32 %v5101_v62, %v4283_v10  ;;  %v4286_v11 = vpop.f32.mrb[60].mxu1 }
 0x193   :  { %v3272_v16 = vadd.f32 %v3271_v24, %v3012_v9  ;;  %v3013_v14 = vmax.f32 %v2757_v46, 0.0  ;;  %v4158_v55 = vpop.f32.mrb[64].mxu0  ;;  %v2622_v50 = vmul.f32 %v5101_v62, %v2158_v41  ;;  %v2886_v9 = vadd.f32 %v5108_v52, %v2623_v34  ;;  %v2171_v43 = vpop.f32.mrb[61].mxu1 }
 0x194   :  { %v2499_v30 = vmul.f32 %v5101_v62, %v4158_v55  ;;  %v1659_v33 = vpop.f32.mrb[65].mxu0  ;;  %v3417_v21 = vadd.f32 %v3416_v35, %v3137_v12  ;;  %v3015_v5 = vmax.f32 %v2759_v6, 0.0  ;;  %v5131_v10 = vmul.f32 0.00390625, %v5020_v61 }
 0x195   :  { %v3273_v40 = vadd.f32 %v3272_v16, %v3013_v14  ;;  %v2497_v54 = vmul.f32 %v5101_v62, %v1659_v33  ;;  %v4159_v45 = vpop.f32.mrb[66].mxu0  ;;  %v3140_v18 = vmax.f32 %v2884_v51, 0.0  ;;  %v4287_v16 = vpop.f32.mrb[62].mxu1  ;;  %v2887_v12 = vadd.f32 %v5108_v52, %v2624_v4 }
 0x196   :  { %v2762_v13 = vadd.f32 %v5108_v52, %v2499_v30  ;;  %v2500_v39 = vmul.f32 %v5101_v62, %v4159_v45  ;;  %v1662_v3 = vpop.f32.mrb[67].mxu0  ;;  %v3418_v41 = vadd.f32 %v3417_v21, %v3138_v8  ;;  %v2885_v34 = vadd.f32 %v5108_v52, %v2622_v50  ;;  %v2174_v6 = vpop.f32.mrb[63].mxu1 }
 0x197   :  { %v3274_v24 = vadd.f32 %v3273_v40, %v3014_v20  ;;  %v2760_v46 = vadd.f32 %v5108_v52, %v2497_v54  ;;  %v2498_v58 = vmul.f32 %v5101_v62, %v1662_v3  ;;  %v3142_v33 = vmax.f32 %v2886_v9, 0.0 }
 0x198   :  { %v3018_v20 = vmax.f32 %v2762_v13, 0.0  ;;  %v2763_v30 = vadd.f32 %v5108_v52, %v2500_v39  ;;  %v3419_v35 = vadd.f32 %v3418_v41, %v3139_v47  ;;  %v3141_v8 = vmax.f32 %v2885_v34, 0.0  ;;  %v4290_v34 = vpop.f32.mrb[64].mxu1 }
 0x199   :  { %v3275_v14 = vadd.f32 %v3274_v24, %v3015_v5  ;;  %v2761_v55 = vadd.f32 %v5108_v52, %v2498_v58  ;;  %v3016_v54 = vmax.f32 %v2760_v46, 0.0  ;;  %v2627_v5 = vmul.f32 %v5101_v62, %v4286_v11 }
 0x19a   :  { %v3420_v21 = vadd.f32 %v3419_v35, %v3140_v18  ;;  %v2625_v4 = vmul.f32 %v5101_v62, %v2171_v43  ;;  %v3143_v9 = vmax.f32 %v2887_v12, 0.0  ;;  %v3019_v47 = vmax.f32 %v2763_v30, 0.0 }
 0x19b   :  { %v3276_v40 = vrot.slane %v3275_v14, 4  ;;  %v3017_v61 = vmax.f32 %v2761_v55, 0.0  ;;  %v4162_v45 = vpop.f32.mrb[68].mxu0  ;;  %v2628_v55 = vmul.f32 %v5101_v62, %v4287_v16  ;;  %v2890_v12 = vadd.f32 %v5108_v52, %v2627_v5 }
 0x19c   :  { %v2503_v51 = vmul.f32 %v5101_v62, %v4162_v45  ;;  %v1675_v3 = vpop.f32.mrb[69].mxu0  ;;  %v3421_v41 = vadd.f32 %v3420_v21, %v3141_v8  ;;  %v2888_v30 = vadd.f32 %v5108_v52, %v2625_v4  ;;  %v3512_v21 = vpack.c.bf16 %v5131_v10, %v5131_v10 }
 0x19d   :  { %v3277_v50 = vadd.f32 %v3276_v40, %v3275_v14  ;;  %v3282_v24 = vadd.f32 %v3017_v61, %v3016_v54  ;;  %v2501_v13 = vmul.f32 %v5101_v62, %v1675_v3  ;;  %v4163_v39 = vpop.f32.mrb[70].mxu0  ;;  %v2187_v14 = vpop.f32.mrb[65].mxu1 }
 0x19e   :  { %v2504_v46 = vmul.f32 %v5101_v62, %v4163_v39  ;;  %v1678_v58 = vpop.f32.mrb[71].mxu0  ;;  %v2766_v35 = vadd.f32 %v5108_v52, %v2503_v51  ;;  %v3422_v40 = vadd.f32 %v3421_v41, %v3142_v33  ;;  %v5148_v54 = vpop.f32.mrb[66].mxu1  ;;  %v2626_v33 = vmul.f32 %v5101_v62, %v2174_v6 }
 0x19f   :  { %v3278_v45 = vrot.slane %v3277_v50, 2  ;;  %v3283_v18 = vadd.f32 %v3282_v24, %v3018_v20  ;;  %v2764_v11 = vadd.f32 %v5108_v52, %v2501_v13  ;;  %v2502_v43 = vmul.f32 %v5101_v62, %v1678_v58  ;;  %v5151_v20 = vpop.f32.mrb[67].mxu1 }
 0x1a0   :  { %v2767_v24 = vadd.f32 %v5108_v52, %v2504_v46  ;;  %v5156_v51 = vadd.f32 %v3422_v40, %v3143_v9  ;;  %v3146_v41 = vmax.f32 %v2890_v12, 0.0 }
 0x1a1   :  { %v3279_v61 = vadd.f32 %v3278_v45, %v3277_v50  ;;  %v3020_v8 = vmax.f32 %v2764_v11, 0.0  ;;  %v3284_v16 = vadd.f32 %v3283_v18, %v3019_v47  ;;  %v2765_v3 = vadd.f32 %v5108_v52, %v2502_v43 }
 0x1a2   :  { %5718 = vst [vmem:[#allocation18_spill] sm:$0xff] %v5156_v51  ;;  %v2891_v50 = vadd.f32 %v5108_v52, %v2628_v55  ;;  %v3144_v45 = vmax.f32 %v2888_v30, 0.0  ;;  %v2889_v18 = vadd.f32 %v5108_v52, %v2626_v33  ;;  %v3022_v11 = vmax.f32 %v2766_v35, 0.0 }
 0x1a3   :  { %v3280_v5 = vrot.slane %v3279_v61, 1  ;;  %v3285_v4 = vadd.f32 %v3284_v16, %v3020_v8  ;;  %v3021_v13 = vmax.f32 %v2765_v3, 0.0  ;;  %v4166_v39 = vpop.f32.mrb[72].mxu0  ;;  %v3023_v6 = vmax.f32 %v2767_v24, 0.0  ;;  %v4294_v3 = vpop.f32.mrb[68].mxu1 }
 0x1a4   :  { %v2507_v47 = vmul.f32 %v5101_v62, %v4166_v39  ;;  %v1691_v58 = vpop.f32.mrb[73].mxu0  ;;  %v3145_v16 = vmax.f32 %v2889_v18, 0.0  ;;  %v2629_v55 = vmul.f32 %v5101_v62, %v2187_v14  ;;  %v3147_v33 = vmax.f32 %v2891_v50, 0.0 }
 0x1a5   :  { %v3281_v10 = vadd.f32 %v3280_v5, %v3279_v61  ;;  %v3286_v46 = vadd.f32 %v3285_v4, %v3021_v13  ;;  %v2505_v9 = vmul.f32 %v5101_v62, %v1691_v58  ;;  %v4167_v43 = vpop.f32.mrb[74].mxu0  ;;  %v2203_v61 = vpop.f32.mrb[69].mxu1 }
 0x1a6   :  { %v2508_v40 = vmul.f32 %v5101_v62, %v4167_v43  ;;  %v1694_v8 = vpop.f32.mrb[75].mxu0  ;;  %v2770_v35 = vadd.f32 %v5108_v52, %v2507_v47  ;;  %v3430_v5 = vadd.f32 %v3145_v16, %v3144_v45  ;;  %v4295_v24 = vpop.f32.mrb[70].mxu1  ;;  %v2892_v50 = vadd.f32 %v5108_v52, %v2629_v55 }
 0x1a7   :  { %v3505_v39 = vmul.f32 0.00390625, %v3281_v10  ;;  %v3287_v42 = vadd.f32 %v3286_v46, %v3022_v11  ;;  %v2768_v12 = vadd.f32 %v5108_v52, %v2505_v9  ;;  %v2506_v30 = vmul.f32 %v5101_v62, %v1694_v8  ;;  %v5169_v14 = vpop.f32.mrb[71].mxu1 }
 0x1a8   :  { %v3551_v10 = vunpack.c.l.b16 %v3512_v21  ;;  %v2771_v11 = vadd.f32 %v5108_v52, %v2508_v40  ;;  %v3431_v46 = vadd.f32 %v3430_v5, %v3146_v41  ;;  %v2631_v9 = vmul.f32 %v5101_v62, %v4290_v34 }
 0x1a9   :  { %v3513_v4 = vpack.c.bf16 %v3505_v39, %v3505_v39  ;;  %v3024_v13 = vmax.f32 %v2768_v12, 0.0  ;;  %v3288_v58 = vadd.f32 %v3287_v42, %v3023_v6  ;;  %v2769_v18 = vadd.f32 %v5108_v52, %v2506_v30 }
 0x1aa   :  { %v3026_v45 = vmax.f32 %v2770_v35, 0.0  ;;  %v3432_v6 = vadd.f32 %v3431_v46, %v3147_v33  ;;  %v3148_v12 = vmax.f32 %v2892_v50, 0.0  ;;  %v3027_v34 = vmax.f32 %v2771_v11, 0.0  ;;  %v4298_v35 = vpop.f32.mrb[72].mxu1 }
 0x1ab   :  { %v3552_v43 = vunpack.c.l.b16 %v3513_v4  ;;  %v3289_v8 = vadd.f32 %v3288_v58, %v3024_v13  ;;  %v3025_v38 = vmax.f32 %v2769_v18, 0.0  ;;  %v4170_v47 = vpop.f32.mrb[76].mxu0  ;;  %v2894_v4 = vadd.f32 %v5108_v52, %v2631_v9  ;;  %v2219_v18 = vpop.f32.mrb[73].mxu1 }
 0x1ac   :  { %v2511_v16 = vmul.f32 %v5101_v62, %v4170_v47  ;;  %v1707_v42 = vpop.f32.mrb[77].mxu0  ;;  %v2632_v55 = vmul.f32 %v5101_v62, %v5148_v54  ;;  %v4299_v46 = vpop.f32.mrb[74].mxu1  ;;  %v2630_v9 = vmul.f32 %v5101_v62, %v5151_v20 }
 0x1ad   :  { %v5176_v39 = vsel %vm3559_vm3, %v3552_v43, %v3551_v10  ;;  %v3290_v21 = vadd.f32 %v3289_v8, %v3025_v38  ;;  %v2509_v40 = vmul.f32 %v5101_v62, %v1707_v42  ;;  %v4171_v41 = vpop.f32.mrb[78].mxu0  ;;  %v3433_v38 = vadd.f32 %v3432_v6, %v3148_v12  ;;  %v5189_v47 = vpop.f32.mrb[75].mxu1 }
 0x1ae   :  { %v2512_v30 = vmul.f32 %v5101_v62, %v4171_v41  ;;  %v1710_v5 = vpop.f32.mrb[79].mxu0  ;;  %v2774_v10 = vadd.f32 %v5108_v52, %v2511_v16  ;;  %v3150_v50 = vmax.f32 %v2894_v4, 0.0  ;;  %v2635_v42 = vmul.f32 %v5101_v62, %v4294_v3 }
 0x1af   :  { %v3291_v13 = vadd.f32 %v3290_v21, %v3026_v45  ;;  %v2772_v33 = vadd.f32 %v5108_v52, %v2509_v40  ;;  %v2510_v58 = vmul.f32 %v5101_v62, %v1710_v5  ;;  %v2895_v45 = vadd.f32 %v5108_v52, %v2632_v55 }
 0x1b0   :  { %v2775_v54 = vadd.f32 %v5108_v52, %v2512_v30  ;;  %v2893_v40 = vadd.f32 %v5108_v52, %v2630_v9  ;;  %v2633_v41 = vmul.f32 %v5101_v62, %v2203_v61  ;;  %v3030_v12 = vmax.f32 %v2774_v10, 0.0 }
 0x1b1   :  { %v3028_v11 = vmax.f32 %v2772_v33, 0.0  ;;  %v3292_v43 = vadd.f32 %v3291_v13, %v3027_v34  ;;  %v2773_v8 = vadd.f32 %v5108_v52, %v2510_v58  ;;  %v5198_v5 = vadd.f32 %v5108_v52, %v2635_v42 }
 0x1b2   :  { %v2636_v30 = vmul.f32 %v5101_v62, %v4295_v24  ;;  %v3149_v13 = vmax.f32 %v2893_v40, 0.0  ;;  %v2896_v33 = vadd.f32 %v5108_v52, %v2633_v41  ;;  %v3031_v58 = vmax.f32 %v2775_v54, 0.0 }
 0x1b3   :  { %v3293_v6 = vadd.f32 %v3292_v43, %v3028_v11  ;;  %v3029_v21 = vmax.f32 %v2773_v8, 0.0  ;;  %v4174_v16 = vpop.f32.mrb[80].mxu0  ;;  %v3151_v43 = vmax.f32 %v2895_v45, 0.0  ;;  %v4302_v8 = vpop.f32.mrb[76].mxu1  ;;  %v3154_v40 = vmax.f32 %v5198_v5, 0.0 }
 0x1b4   :  { %v2515_v34 = vmul.f32 %v5101_v62, %v4174_v16  ;;  %v1723_v20 = vpop.f32.mrb[81].mxu0  ;;  %v2899_v54 = vadd.f32 %v5108_v52, %v2636_v30  ;;  %v2637_v5 = vmul.f32 %v5101_v62, %v2219_v18 }
 0x1b5   :  { %v3294_v4 = vadd.f32 %v3293_v6, %v3029_v21  ;;  %v2513_v55 = vmul.f32 %v5101_v62, %v1723_v20  ;;  %v4175_v3 = vpop.f32.mrb[82].mxu0  ;;  %v3434_v6 = vadd.f32 %v3433_v38, %v3149_v13  ;;  %v2235_v21 = vpop.f32.mrb[77].mxu1  ;;  %v3152_v20 = vmax.f32 %v2896_v33, 0.0 }
 0x1b6   :  { %v2778_v11 = vadd.f32 %v5108_v52, %v2515_v34  ;;  %v2516_v61 = vmul.f32 %v5101_v62, %v4175_v3  ;;  %v1726_v10 = vpop.f32.mrb[83].mxu0  ;;  %v4303_v41 = vpop.f32.mrb[78].mxu1  ;;  %v2634_v38 = vmul.f32 %v5101_v62, %v5169_v14  ;;  %v2900_v14 = vadd.f32 %v5108_v52, %v2637_v5 }
 0x1b7   :  { %v3295_v9 = vadd.f32 %v3294_v4, %v3030_v12  ;;  %v2776_v42 = vadd.f32 %v5108_v52, %v2513_v55  ;;  %v2514_v24 = vmul.f32 %v5101_v62, %v1726_v10  ;;  %v3435_v45 = vadd.f32 %v3434_v6, %v3150_v50  ;;  %v5210_v51 = vpop.f32.mrb[79].mxu1 }
 0x1b8   :  { %v3034_v16 = vmax.f32 %v2778_v11, 0.0  ;;  %v2779_v12 = vadd.f32 %v5108_v52, %v2516_v61  ;;  %v2639_v4 = vmul.f32 %v5101_v62, %v4298_v35  ;;  %v2897_v10 = vadd.f32 %v5108_v52, %v2634_v38 }
 0x1b9   :  { %v3032_v34 = vmax.f32 %v2776_v42, 0.0  ;;  %v3296_v28 = vadd.f32 %v3295_v9, %v3031_v58  ;;  %v2777_v3 = vadd.f32 %v5108_v52, %v2514_v24  ;;  %v3436_v33 = vadd.f32 %v3435_v45, %v3151_v43 }
 0x1ba   :  { %v2640_v58 = vmul.f32 %v5101_v62, %v4299_v46  ;;  %v5221_v61 = vadd.f32 %v5108_v52, %v2639_v4  ;;  %v3155_v42 = vmax.f32 %v2899_v54, 0.0  ;;  %v3035_v24 = vmax.f32 %v2779_v12, 0.0 }
 0x1bb   :  { %v3297_v55 = vadd.f32 %v3296_v28, %v3032_v34  ;;  %v3033_v13 = vmax.f32 %v2777_v3, 0.0  ;;  %v4178_v30 = vpop.f32.mrb[84].mxu0  ;;  %v3437_v28 = vadd.f32 %v3436_v33, %v3152_v20  ;;  %v3153_v34 = vmax.f32 %v2897_v10, 0.0  ;;  %v4306_v3 = vpop.f32.mrb[80].mxu1 }
 0x1bc   :  { %v2519_v11 = vmul.f32 %v5101_v62, %v4178_v30  ;;  %v1739_v50 = vpop.f32.mrb[85].mxu0  ;;  %v5230_v5 = vadd.f32 %v5108_v52, %v2640_v58  ;;  %v3158_v54 = vmax.f32 %v5221_v61, 0.0  ;;  %v3156_v12 = vmax.f32 %v2900_v14, 0.0 }
 0x1bd   :  { %v3298_v9 = vadd.f32 %v3297_v55, %v3033_v13  ;;  %v2517_v35 = vmul.f32 %v5101_v62, %v1739_v50  ;;  %v4179_v18 = vpop.f32.mrb[86].mxu0  ;;  %v2251_v55 = vpop.f32.mrb[81].mxu1  ;;  %v3438_v20 = vadd.f32 %v3437_v28, %v3153_v34 }
 0x1be   :  { %v2782_v43 = vadd.f32 %v5108_v52, %v2519_v11  ;;  %v2520_v46 = vmul.f32 %v5101_v62, %v4179_v18  ;;  %v1742_v6 = vpop.f32.mrb[87].mxu0  ;;  %v4307_v30 = vpop.f32.mrb[82].mxu1  ;;  %v2641_v18 = vmul.f32 %v5101_v62, %v2235_v21 }
 0x1bf   :  { %v3299_v45 = vadd.f32 %v3298_v9, %v3034_v16  ;;  %v2780_v38 = vadd.f32 %v5108_v52, %v2517_v35  ;;  %v2518_v4 = vmul.f32 %v5101_v62, %v1742_v6  ;;  %v2638_v16 = vmul.f32 %v5101_v62, %v5189_v47  ;;  %v5236_v10 = vpop.f32.mrb[83].mxu1 }
 0x1c0   :  { %v3038_v13 = vmax.f32 %v2782_v43, 0.0  ;;  %v2783_v9 = vadd.f32 %v5108_v52, %v2520_v46  ;;  %v3439_v58 = vadd.f32 %v3438_v20, %v3154_v40  ;;  %v2643_v35 = vmul.f32 %v5101_v62, %v4302_v8 }
 0x1c1   :  { %v3036_v33 = vmax.f32 %v2780_v38, 0.0  ;;  %v3300_v11 = vadd.f32 %v3299_v45, %v3035_v24  ;;  %v2781_v50 = vadd.f32 %v5108_v52, %v2518_v4  ;;  %v2901_v43 = vadd.f32 %v5108_v52, %v2638_v16 }
 0x1c2   :  { %v2644_v24 = vmul.f32 %v5101_v62, %v4303_v41  ;;  %v3440_v47 = vadd.f32 %v3439_v58, %v3155_v42  ;;  %v5245_v45 = vadd.f32 %v5108_v52, %v2643_v35  ;;  %v2904_v40 = vadd.f32 %v5108_v52, %v2641_v18  ;;  %v5252_v42 = vpop.f32.mrb[84].mxu1 }
 0x1c3   :  { %v3301_v28 = vadd.f32 %v3300_v11, %v3036_v33  ;;  %v3037_v61 = vmax.f32 %v2781_v50, 0.0  ;;  %v4182_v14 = vpop.f32.mrb[88].mxu0  ;;  %v3159_v38 = vmax.f32 %v5230_v5, 0.0  ;;  %v3157_v4 = vmax.f32 %v2901_v43, 0.0  ;;  %v4516_v5 = vld [vmem:[#allocation7 + $0x28] sm:$0xff]  }
 0x1c4   :  { %v2523_v6 = vmul.f32 %v5101_v62, %v4182_v14  ;;  %v1755_v34 = vpop.f32.mrb[89].mxu0  ;;  %v3039_v20 = vmax.f32 %v2783_v9, 0.0  ;;  %v3441_v50 = vadd.f32 %v3440_v47, %v3156_v12  ;;  %v5257_v18 = vadd.f32 %v5108_v52, %v2644_v24  ;;  %4359 = vmatpush3.bf16.msra.mxu1 %v4516_v5  ;;  %v4517_v24 = vld [vmem:[#allocation7 + $0x30] sm:$0xff]  }
 0x1c5   :  { %v3302_v46 = vadd.f32 %v3301_v28, %v3037_v61  ;;  %v2521_v8 = vmul.f32 %v5101_v62, %v1755_v34  ;;  %v4183_v21 = vpop.f32.mrb[90].mxu0  ;;  %v2267_v28 = vpop.f32.mrb[85].mxu1  ;;  %v3162_v14 = vmax.f32 %v5245_v45, 0.0  ;;  %v3160_v43 = vmax.f32 %v2904_v40, 0.0 }
 0x1c6   :  { %v2786_v33 = vadd.f32 %v5108_v52, %v2523_v6  ;;  %v2524_v41 = vmul.f32 %v5101_v62, %v4183_v21  ;;  %v1758_v11 = vpop.f32.mrb[91].mxu0  ;;  %v3442_v9 = vadd.f32 %v3441_v50, %v3157_v4  ;;  %v4311_v6 = vpop.f32.mrb[86].mxu1  ;;  %v2647_v4 = vmul.f32 %v5101_v62, %v4306_v3 }
 0x1c7   :  { %v3303_v16 = vadd.f32 %v3302_v46, %v3038_v13  ;;  %v2784_v58 = vadd.f32 %v5108_v52, %v2521_v8  ;;  %v2522_v35 = vmul.f32 %v5101_v62, %v1758_v11  ;;  %v2642_v13 = vmul.f32 %v5101_v62, %v5210_v51  ;;  %v5263_v46 = vpop.f32.mrb[87].mxu1 }
 0x1c8   :  { %v3042_v61 = vmax.f32 %v2786_v33, 0.0  ;;  %v2787_v8 = vadd.f32 %v5108_v52, %v2524_v41  ;;  %v3443_v21 = vadd.f32 %v3442_v9, %v3158_v54  ;;  %v2645_v45 = vmul.f32 %v5101_v62, %v2251_v55 }
 0x1c9   :  { %v3040_v34 = vmax.f32 %v2784_v58, 0.0  ;;  %v3304_v12 = vadd.f32 %v3303_v16, %v3039_v20  ;;  %v2785_v47 = vadd.f32 %v5108_v52, %v2522_v35  ;;  %v5719_v40 = vmov 0.0  }
 0x1ca   :  { %4360 = vmatprep.subr.bf16.mxu1 %v5719_v40  ;;  %v2905_v50 = vadd.f32 %v5108_v52, %v2642_v13  ;;  %v2648_v51 = vmul.f32 %v5101_v62, %v4307_v30  ;;  %v3444_v35 = vadd.f32 %v3443_v21, %v3159_v38  ;;  %v5273_v41 = vadd.f32 %v5108_v52, %v2647_v4  ;;  %v4314_v4 = vpop.f32.mrb[88].mxu1 }
 0x1cb   :  { %v3305_v33 = vadd.f32 %v3304_v12, %v3040_v34  ;;  %v3041_v20 = vmax.f32 %v2785_v47, 0.0  ;;  %v4186_v11 = vpop.f32.mrb[92].mxu0  ;;  %v2908_v3 = vadd.f32 %v5108_v52, %v2645_v45  ;;  %v3163_v9 = vmax.f32 %v5257_v18, 0.0  ;;  %4361 = vmatpush3.bf16.msra.mxu1 %v4517_v24  ;;  %v4518_v12 = vld [vmem:[#allocation7 + $0x38] sm:$0xff]   ;;  %v2283_v24 = vpop.f32.mrb[89].mxu1  ;;  %4364 = vmatprep.mubr.msk.bf16.mxu1 %vm4624_vm5, %v5719_v40 }
 0x1cc   :  { %v2527_v16 = vmul.f32 %v5101_v62, %v4186_v11  ;;  %v1771_v58 = vpop.f32.mrb[93].mxu0  ;;  %v3161_v34 = vmax.f32 %v2905_v50, 0.0  ;;  %v3043_v47 = vmax.f32 %v2787_v8, 0.0  ;;  %v3445_v21 = vadd.f32 %v3444_v35, %v3160_v43  ;;  %4362 = vmatprep.subr.bf16.mxu1 %v5719_v40 }
 0x1cd   :  { %v3306_v54 = vadd.f32 %v3305_v33, %v3041_v20  ;;  %v2525_v55 = vmul.f32 %v5101_v62, %v1771_v58  ;;  %v4187_v5 = vpop.f32.mrb[94].mxu0  ;;  %v5284_v18 = vadd.f32 %v5108_v52, %v2648_v51  ;;  %v3166_v50 = vmax.f32 %v5273_v41, 0.0  ;;  %v4315_v58 = vpop.f32.mrb[90].mxu1 }
 0x1ce   :  { %v2790_v30 = vadd.f32 %v5108_v52, %v2527_v16  ;;  %v2528_v13 = vmul.f32 %v5101_v62, %v4187_v5  ;;  %v1774_v38 = vpop.f32.mrb[95].mxu0  ;;  %v3446_v8 = vadd.f32 %v3445_v21, %v3161_v34  ;;  %v3164_v16 = vmax.f32 %v2908_v3, 0.0 }
 0x1cf   :  { %v3307_v45 = vadd.f32 %v3306_v54, %v3042_v61  ;;  %v2788_v33 = vadd.f32 %v5108_v52, %v2525_v55  ;;  %v2526_v20 = vmul.f32 %v5101_v62, %v1774_v38  ;;  %v2646_v61 = vmul.f32 %v5101_v62, %v5236_v10  ;;  %v5290_v54 = vpop.f32.mrb[91].mxu1  ;;  %4363 = vmatpush3.bf16.msra.mxu1 %v4518_v12 }
 0x1d0   :  { %v3046_v11 = vmax.f32 %v2790_v30, 0.0  ;;  %v2791_v51 = vadd.f32 %v5108_v52, %v2528_v13  ;;  %v3447_v55 = vadd.f32 %v3446_v8, %v3162_v14  ;;  %v2651_v34 = vmul.f32 %v5101_v62, %v5252_v42 }
 0x1d1   :  { %v3044_v5 = vmax.f32 %v2788_v33, 0.0  ;;  %v3308_v43 = vadd.f32 %v3307_v45, %v3043_v47  ;;  %v2789_v35 = vadd.f32 %v5108_v52, %v2526_v20  ;;  %v2649_v41 = vmul.f32 %v5101_v62, %v2267_v28 }
 0x1d2   :  { %v2909_v47 = vadd.f32 %v5108_v52, %v2646_v61  ;;  %v2652_v21 = vmul.f32 %v5101_v62, %v4311_v6  ;;  %v3448_v33 = vadd.f32 %v3447_v55, %v3163_v9  ;;  %v5300_v12 = vadd.f32 %v5108_v52, %v2651_v34  ;;  %v5307_v9 = vpop.f32.mrb[92].mxu1 }
 0x1d3   :  { %v3309_v3 = vadd.f32 %v3308_v43, %v3044_v5  ;;  %v3045_v30 = vmax.f32 %v2789_v35, 0.0  ;;  %v4190_v38 = vpop.f32.mrb[96].mxu0  ;;  %v2912_v14 = vadd.f32 %v5108_v52, %v2649_v41  ;;  %v3167_v20 = vmax.f32 %v5284_v18, 0.0 }
 0x1d4   :  { %v2531_v10 = vmul.f32 %v5101_v62, %v4190_v38  ;;  %v1787_v45 = vpop.f32.mrb[97].mxu0  ;;  %v3165_v8 = vmax.f32 %v2909_v47, 0.0  ;;  %v3047_v5 = vmax.f32 %v2791_v51, 0.0  ;;  %v3449_v61 = vadd.f32 %v3448_v33, %v3164_v16 }
 0x1d5   :  { %v3310_v13 = vadd.f32 %v3309_v3, %v3045_v30  ;;  %v2529_v42 = vmul.f32 %v5101_v62, %v1787_v45  ;;  %v4191_v28 = vpop.f32.mrb[98].mxu0  ;;  %v5312_v3 = vadd.f32 %v5108_v52, %v2652_v21  ;;  %v5314_v30 = vpop.f32.mrb[93].mxu1  ;;  %v3170_v38 = vmax.f32 %v5300_v12, 0.0 }
 0x1d6   :  { %v2794_v43 = vadd.f32 %v5108_v52, %v2531_v10  ;;  %v2532_v6 = vmul.f32 %v5101_v62, %v4191_v28  ;;  %v1790_v35 = vpop.f32.mrb[99].mxu0  ;;  %v3450_v51 = vadd.f32 %v3449_v61, %v3165_v8  ;;  %v3168_v47 = vmax.f32 %v2912_v14, 0.0  ;;  %v5318_v10 = vpop.f32.mrb[94].mxu1 }
 0x1d7   :  { %v3311_v55 = vadd.f32 %v3310_v13, %v3046_v11  ;;  %v2792_v34 = vadd.f32 %v5108_v52, %v2529_v42  ;;  %v2530_v41 = vmul.f32 %v5101_v62, %v1790_v35  ;;  %v2650_v33 = vmul.f32 %v5101_v62, %v5263_v46  ;;  %v5323_v13 = vpop.f32.mrb[95].mxu1 }
 0x1d8   :  { %v2795_v18 = vadd.f32 %v5108_v52, %v2532_v6  ;;  %v3050_v45 = vmax.f32 %v2794_v43, 0.0  ;;  %v3451_v42 = vadd.f32 %v3450_v51, %v3166_v50  ;;  %v2655_v28 = vmul.f32 %v5101_v62, %v4314_v4 }
 0x1d9   :  { %v3312_v16 = vadd.f32 %v3311_v55, %v3047_v5  ;;  %v2793_v11 = vadd.f32 %v5108_v52, %v2530_v41  ;;  %v3048_v21 = vmax.f32 %v2792_v34, 0.0  ;;  %v2653_v8 = vmul.f32 %v5101_v62, %v2283_v24 }
 0x1da   :  { %v3051_v12 = vmax.f32 %v2795_v18, 0.0  ;;  %v2913_v5 = vadd.f32 %v5108_v52, %v2650_v33  ;;  %v3452_v55 = vadd.f32 %v3451_v42, %v3167_v20  ;;  %v5330_v46 = vadd.f32 %v5108_v52, %v2655_v28  ;;  %v5337_v20 = vpop.f32.mrb[96].mxu1 }
 0x1db   :  { %v3313_v6 = vrot.slane %v3312_v16, 4  ;;  %v3049_v14 = vmax.f32 %v2793_v11, 0.0  ;;  %v4194_v35 = vpop.f32.mrb[100].mxu0  ;;  %v2656_v34 = vmul.f32 %v5101_v62, %v4315_v58 }
 0x1dc   :  { %v2535_v43 = vmul.f32 %v5101_v62, %v4194_v35  ;;  %v1803_v61 = vpop.f32.mrb[101].mxu0  ;;  %v3169_v51 = vmax.f32 %v2913_v5, 0.0  ;;  %v3453_v44 = vadd.f32 %v3452_v55, %v3168_v47  ;;  %v2916_v35 = vadd.f32 %v5108_v52, %v2653_v8 }
 0x1dd   :  { %v3314_v50 = vadd.f32 %v3313_v6, %v3312_v16  ;;  %v3319_v41 = vadd.f32 %v3049_v14, %v3048_v21  ;;  %v2533_v4 = vmul.f32 %v5101_v62, %v1803_v61  ;;  %v4195_v24 = vpop.f32.mrb[102].mxu0  ;;  %v5341_v21 = vpop.f32.mrb[97].mxu1  ;;  %v3171_v14 = vmax.f32 %v5312_v3, 0.0 }
 0x1de   :  { %v2798_v18 = vadd.f32 %v5108_v52, %v2535_v43  ;;  %v2536_v11 = vmul.f32 %v5101_v62, %v4195_v24  ;;  %v1806_v33 = vpop.f32.mrb[103].mxu0  ;;  %v3454_v5 = vadd.f32 %v3453_v44, %v3169_v51  ;;  %v3174_v43 = vmax.f32 %v5330_v46, 0.0  ;;  %v5346_v47 = vpop.f32.mrb[98].mxu1 }
 0x1df   :  { %v3315_v42 = vrot.slane %v3314_v50, 2  ;;  %v3320_v28 = vadd.f32 %v3319_v41, %v3050_v45  ;;  %v2796_v58 = vadd.f32 %v5108_v52, %v2533_v4  ;;  %v2534_v16 = vmul.f32 %v5101_v62, %v1806_v33  ;;  %v5349_v41 = vpop.f32.mrb[99].mxu1 }
 0x1e0   :  { %v2799_v6 = vadd.f32 %v5108_v52, %v2536_v11  ;;  %v3054_v4 = vmax.f32 %v2798_v18, 0.0  ;;  %v3455_v24 = vadd.f32 %v3454_v5, %v3170_v38  ;;  %v3172_v33 = vmax.f32 %v2916_v35, 0.0 }
 0x1e1   :  { %v3316_v8 = vadd.f32 %v3315_v42, %v3314_v50  ;;  %v3052_v61 = vmax.f32 %v2796_v58, 0.0  ;;  %v3321_v55 = vadd.f32 %v3320_v28, %v3051_v12  ;;  %v2797_v45 = vadd.f32 %v5108_v52, %v2534_v16 }
 0x1e2   :  { %v2654_v11 = vmul.f32 %v5101_v62, %v5290_v54  ;;  %v2919_v46 = vadd.f32 %v5108_v52, %v2656_v34  ;;  %v3456_v12 = vadd.f32 %v3455_v24, %v3171_v14  ;;  %v2659_v18 = vmul.f32 %v5101_v62, %v5307_v9 }
 0x1e3   :  { %v3317_v37 = vrot.slane %v3316_v8, 1  ;;  %v3322_v3 = vadd.f32 %v3321_v55, %v3052_v61  ;;  %v3053_v44 = vmax.f32 %v2797_v45, 0.0  ;;  %v4198_v51 = vpop.f32.mrb[104].mxu0  ;;  %v3055_v35 = vmax.f32 %v2799_v6, 0.0 }
 0x1e4   :  { %v2539_v50 = vmul.f32 %v5101_v62, %v4198_v51  ;;  %v1819_v42 = vpop.f32.mrb[105].mxu0  ;;  %v2917_v28 = vadd.f32 %v5108_v52, %v2654_v11  ;;  %v3457_v55 = vadd.f32 %v3456_v12, %v3172_v33  ;;  %v5361_v51 = vpop.f32.mrb[100].mxu1  ;;  %v3175_v6 = vmax.f32 %v2919_v46, 0.0 }
 0x1e5   :  { %v3318_v38 = vadd.f32 %v3317_v37, %v3316_v8  ;;  %v3323_v58 = vadd.f32 %v3322_v3, %v3053_v44  ;;  %v2537_v54 = vmul.f32 %v5101_v62, %v1819_v42  ;;  %v4199_v16 = vpop.f32.mrb[106].mxu0  ;;  %v5365_v9 = vpop.f32.mrb[101].mxu1  ;;  %v2922_v3 = vadd.f32 %v5108_v52, %v2659_v18 }
 0x1e6   :  { %v2802_v5 = vadd.f32 %v5108_v52, %v2539_v50  ;;  %v2540_v61 = vmul.f32 %v5101_v62, %v4199_v16  ;;  %v1822_v34 = vpop.f32.mrb[107].mxu0  ;;  %v3173_v45 = vmax.f32 %v2917_v28, 0.0  ;;  %v5368_v44 = vpop.f32.mrb[102].mxu1 }
 0x1e7   :  { %v3506_v14 = vmul.f32 0.00390625, %v3318_v38  ;;  %v3324_v24 = vadd.f32 %v3323_v58, %v3054_v4  ;;  %v2800_v11 = vadd.f32 %v5108_v52, %v2537_v54  ;;  %v2538_v37 = vmul.f32 %v5101_v62, %v1822_v34  ;;  %v5371_v28 = vpop.f32.mrb[103].mxu1 }
 0x1e8   :  { %v3458_v8 = vadd.f32 %v3457_v55, %v3173_v45  ;;  %v3058_v4 = vmax.f32 %v2802_v5, 0.0  ;;  %v2803_v38 = vadd.f32 %v5108_v52, %v2540_v61  ;;  %v2657_v54 = vmul.f32 %v5101_v62, %v5314_v30 }
 0x1e9   :  { %v3514_v50 = vpack.c.bf16 %v3506_v14, %v3506_v14  ;;  %v3056_v33 = vmax.f32 %v2800_v11, 0.0  ;;  %v3325_v42 = vadd.f32 %v3324_v24, %v3055_v35  ;;  %v2801_v12 = vadd.f32 %v5108_v52, %v2538_v37 }
 0x1ea   :  { %v3459_v58 = vadd.f32 %v3458_v8, %v3174_v43  ;;  %v2658_v55 = vmul.f32 %v5101_v62, %v5323_v13  ;;  %v2920_v5 = vadd.f32 %v5108_v52, %v2657_v54  ;;  %v2660_v43 = vmul.f32 %v5101_v62, %v5318_v10 }
 0x1eb   :  { %v3553_v46 = vunpack.c.l.b16 %v3514_v50  ;;  %v3326_v16 = vadd.f32 %v3325_v42, %v3056_v33  ;;  %v3057_v34 = vmax.f32 %v2801_v12, 0.0  ;;  %v4202_v18 = vpop.f32.mrb[108].mxu0  ;;  %v2567_v37 = vmul.f32 %v5101_v62, %v4848_v19  ;;  %v5395_v33 = vpop.f32.mrb[104].mxu1 }
 0x1ec   :  { %v2543_v35 = vmul.f32 %v5101_v62, %v4202_v18  ;;  %v1835_v45 = vpop.f32.mrb[109].mxu0  ;;  %v5379_v14 = vadd.f32 %v3459_v58, %v3175_v6  ;;  %v2921_v13 = vadd.f32 %v5108_v52, %v2658_v55  ;;  %v2565_v6 = vmul.f32 %v5101_v62, %v4852_v25  ;;  %v5399_v54 = vpop.f32.mrb[105].mxu1 }
 0x1ed   :  { %v5386_v30 = vsel %vm3561_vm4, %v3553_v46, %v5176_v39  ;;  %v3327_v61 = vadd.f32 %v3326_v16, %v3057_v34  ;;  %v2541_v24 = vmul.f32 %v5101_v62, %v1835_v45  ;;  %v4203_v11 = vpop.f32.mrb[110].mxu0  ;;  %v3176_v10 = vmax.f32 %v2920_v5, 0.0  ;;  %v5403_v34 = vpop.f32.mrb[106].mxu1 }
 0x1ee   :  { %5720 = vst [vmem:[#allocation19_spill] sm:$0xff] %v5379_v14  ;;  %v2544_v8 = vmul.f32 %v5101_v62, %v4203_v11  ;;  %v1838_v50 = vpop.f32.mrb[111].mxu0  ;;  %v3059_v39 = vmax.f32 %v2803_v38, 0.0  ;;  %v2806_v46 = vadd.f32 %v5108_v52, %v2543_v35  ;;  %v3178_v19 = vmax.f32 %v2922_v3, 0.0  ;;  %v5406_v38 = vpop.f32.mrb[107].mxu1 }
 0x1ef   :  { %v3328_v42 = vadd.f32 %v3327_v61, %v3058_v4  ;;  %v2804_v12 = vadd.f32 %v5108_v52, %v2541_v24  ;;  %v2542_v58 = vmul.f32 %v5101_v62, %v1838_v50  ;;  %v2923_v16 = vadd.f32 %v5108_v52, %v2660_v43 }
 0x1f0   :  { %v3177_v25 = vmax.f32 %v2921_v13, 0.0  ;;  %v5409_v4 = vadd.f32 %v5108_v52, %v2567_v37  ;;  %v5412_v5 = vadd.f32 %v5108_v52, %v2565_v6  ;;  %v2807_v35 = vadd.f32 %v5108_v52, %v2544_v8  ;;  %v5420_v13 = vld [vmem:[%s5703_s2] ss:$0 sm:$0xff] }
 0x1f1   :  { %v3060_v18 = vmax.f32 %v2804_v12, 0.0  ;;  %v3329_v55 = vadd.f32 %v3328_v42, %v3059_v39  ;;  %v2805_v45 = vadd.f32 %v5108_v52, %v2542_v58  ;;  %v2568_v43 = vmul.f32 %v5101_v62, %v4855_v26  ;;  %v5431_v12 = vld [vmem:[%s5704_s3] ss:$0 sm:$0xff] }
 0x1f2   :  { %v3467_v3 = vadd.f32 %v3177_v25, %v3176_v10  ;;  %v2661_v37 = vmul.f32 %v5420_v13, %v5341_v21  ;;  %v3062_v50 = vmax.f32 %v2806_v46, 0.0  ;;  %v3179_v39 = vmax.f32 %v2923_v16, 0.0  ;;  %v5438_v25 = vpop.f32.mrb[108].mxu1 }
 0x1f3   :  { %v3330_v61 = vadd.f32 %v3329_v55, %v3060_v18  ;;  %v3061_v24 = vmax.f32 %v2805_v45, 0.0  ;;  %v4206_v11 = vpop.f32.mrb[112].mxu0  ;;  %v2663_v52 = vmul.f32 %v5420_v13, %v5337_v20  ;;  %v2566_v46 = vmul.f32 %v5420_v13, %v4860_v32 }
 0x1f4   :  { %v1851_v6 = vpop.f32.mrb[113].mxu0  ;;  %v3468_v42 = vadd.f32 %v3467_v3, %v3178_v19  ;;  %v2547_v26 = vmul.f32 %v5420_v13, %v4206_v11  ;;  %v2924_v21 = vadd.f32 %v5431_v12, %v2661_v37  ;;  %v3063_v19 = vmax.f32 %v2807_v35, 0.0 }
 0x1f5   :  { %v3331_v8 = vadd.f32 %v3330_v61, %v3061_v24  ;;  %v2545_v62 = vmul.f32 %v5420_v13, %v1851_v6  ;;  %v4207_v10 = vpop.f32.mrb[114].mxu0  ;;  %v5442_v61 = vpop.f32.mrb[109].mxu1  ;;  %v2926_v11 = vadd.f32 %v5431_v12, %v2663_v52  ;;  %v2664_v32 = vmul.f32 %v5420_v13, %v5346_v47 }
 0x1f6   :  { %v2548_v20 = vmul.f32 %v5420_v13, %v4207_v10  ;;  %v1854_v16 = vpop.f32.mrb[115].mxu0  ;;  %v3180_v3 = vmax.f32 %v2924_v21, 0.0  ;;  %v3469_v37 = vadd.f32 %v3468_v42, %v3179_v39  ;;  %v5448_v35 = vpop.f32.mrb[110].mxu1  ;;  %v2810_v6 = vadd.f32 %v5431_v12, %v2547_v26 }
 0x1f7   :  { %v3332_v18 = vadd.f32 %v3331_v8, %v3062_v50  ;;  %v2808_v55 = vadd.f32 %v5431_v12, %v2545_v62  ;;  %v2546_v45 = vmul.f32 %v5420_v13, %v1854_v16  ;;  %v5452_v10 = vpop.f32.mrb[111].mxu1  ;;  %v5455_v21 = vadd.f32 %v5431_v12, %v2568_v43 }
 0x1f8   :  { %v2811_v16 = vadd.f32 %v5431_v12, %v2548_v20  ;;  %v3470_v52 = vadd.f32 %v3469_v37, %v3180_v3  ;;  %v2662_v39 = vmul.f32 %v5420_v13, %v5349_v41  ;;  %v2667_v26 = vmul.f32 %v5420_v13, %v5361_v51 }
 0x1f9   :  { %v3064_v50 = vmax.f32 %v2808_v55, 0.0  ;;  %v3333_v8 = vadd.f32 %v3332_v18, %v3063_v19  ;;  %v2809_v62 = vadd.f32 %v5431_v12, %v2546_v45  ;;  %v2665_v19 = vmul.f32 %v5420_v13, %v5365_v9 }
 0x1fa   :  { %v5465_v18 = vadd.f32 %v5431_v12, %v2566_v46  ;;  %v2927_v20 = vadd.f32 %v5431_v12, %v2664_v32  ;;  %v2925_v45 = vadd.f32 %v5431_v12, %v2662_v39  ;;  %v3066_v41 = vmax.f32 %v2810_v6, 0.0 }
 0x1fb   :  { %v3334_v47 = vadd.f32 %v3333_v8, %v3064_v50  ;;  %v3065_v42 = vmax.f32 %v2809_v62, 0.0  ;;  %v4210_v58 = vpop.f32.mrb[116].mxu0  ;;  %v3182_v8 = vmax.f32 %v2926_v11, 0.0  ;;  %v2930_v46 = vadd.f32 %v5431_v12, %v2667_v26 }
 0x1fc   :  { %v2551_v43 = vmul.f32 %v5420_v13, %v4210_v58  ;;  %v1867_v55 = vpop.f32.mrb[117].mxu0  ;;  %v3181_v9 = vmax.f32 %v2925_v45, 0.0  ;;  %v2928_v24 = vadd.f32 %v5431_v12, %v2665_v19  ;;  %v5474_v58 = vpop.f32.mrb[112].mxu1  ;;  %v3067_v14 = vmax.f32 %v2811_v16, 0.0 }
 0x1fd   :  { %v3335_v3 = vadd.f32 %v3334_v47, %v3065_v42  ;;  %v2549_v37 = vmul.f32 %v5420_v13, %v1867_v55  ;;  %v4211_v50 = vpop.f32.mrb[118].mxu0  ;;  %v5478_v47 = vpop.f32.mrb[113].mxu1  ;;  %v3183_v42 = vmax.f32 %v2927_v20, 0.0  ;;  %v2668_v45 = vmul.f32 %v5420_v13, %v5368_v44 }
 0x1fe   :  { %v2552_v51 = vmul.f32 %v5420_v13, %v4211_v50  ;;  %v1870_v62 = vpop.f32.mrb[119].mxu0  ;;  %v2814_v11 = vadd.f32 %v5431_v12, %v2551_v43  ;;  %v3471_v55 = vadd.f32 %v3470_v52, %v3181_v9  ;;  %v5483_v26 = vpop.f32.mrb[114].mxu1  ;;  %v3184_v1 = vmax.f32 %v2928_v24, 0.0 }
 0x1ff   :  { %v3336_v32 = vadd.f32 %v3335_v3, %v3066_v41  ;;  %v2812_v39 = vadd.f32 %v5431_v12, %v2549_v37  ;;  %v2550_v6 = vmul.f32 %v5420_v13, %v1870_v62  ;;  %v5487_v3 = vpop.f32.mrb[115].mxu1  ;;  %v3186_v62 = vmax.f32 %v2930_v46, 0.0 }
 0x200   :  { %v2815_v16 = vadd.f32 %v5431_v12, %v2552_v51  ;;  %v3472_v37 = vadd.f32 %v3471_v55, %v3182_v8  ;;  %v2666_v43 = vmul.f32 %v5420_v13, %v5371_v28  ;;  %v2671_v44 = vmul.f32 %v5420_v13, %v5395_v33 }
 0x201   :  { %v3068_v19 = vmax.f32 %v2812_v39, 0.0  ;;  %v3337_v50 = vadd.f32 %v3336_v32, %v3067_v14  ;;  %v2813_v41 = vadd.f32 %v5431_v12, %v2550_v6  ;;  %v2669_v14 = vmul.f32 %v5420_v13, %v5399_v54 }
 0x202   :  { %v3473_v39 = vadd.f32 %v3472_v37, %v3183_v42  ;;  %v2931_v8 = vadd.f32 %v5431_v12, %v2668_v45  ;;  %v2929_v24 = vadd.f32 %v5431_v12, %v2666_v43  ;;  %v3070_v46 = vmax.f32 %v2814_v11, 0.0 }
 0x203   :  { %v3338_v52 = vadd.f32 %v3337_v50, %v3068_v19  ;;  %v3069_v20 = vmax.f32 %v2813_v41, 0.0  ;;  %v4214_v9 = vpop.f32.mrb[120].mxu0  ;;  %v3071_v6 = vmax.f32 %v2815_v16, 0.0  ;;  %v2932_v54 = vadd.f32 %v5431_v12, %v2669_v14 }
 0x204   :  { %v2555_v51 = vmul.f32 %v5420_v13, %v4214_v9  ;;  %v1883_v32 = vpop.f32.mrb[121].mxu0  ;;  %v3474_v41 = vadd.f32 %v3473_v39, %v3184_v1  ;;  %v3185_v53 = vmax.f32 %v2929_v24, 0.0  ;;  %v5501_v9 = vpop.f32.mrb[116].mxu1  ;;  %v2934_v11 = vadd.f32 %v5431_v12, %v2671_v44 }
 0x205   :  { %v3339_v28 = vadd.f32 %v3338_v52, %v3069_v20  ;;  %v2553_v55 = vmul.f32 %v5420_v13, %v1883_v32  ;;  %v4215_v19 = vpop.f32.mrb[122].mxu0  ;;  %v5506_v16 = vpop.f32.mrb[117].mxu1  ;;  %v3187_v52 = vmax.f32 %v2931_v8, 0.0  ;;  %v2672_v1 = vmul.f32 %v5420_v13, %v5403_v34 }
 0x206   :  { %v2556_v50 = vmul.f32 %v5420_v13, %v4215_v19  ;;  %v1886_v33 = vpop.f32.mrb[123].mxu0  ;;  %v2818_v43 = vadd.f32 %v5431_v12, %v2555_v51  ;;  %v3475_v20 = vadd.f32 %v3474_v41, %v3185_v53  ;;  %v5511_v32 = vpop.f32.mrb[118].mxu1  ;;  %v2670_v51 = vmul.f32 %v5420_v13, %v5406_v38 }
 0x207   :  { %v3340_v42 = vadd.f32 %v3339_v28, %v3070_v46  ;;  %v2816_v45 = vadd.f32 %v5431_v12, %v2553_v55  ;;  %v2554_v37 = vmul.f32 %v5420_v13, %v1886_v33  ;;  %v5515_v28 = vpop.f32.mrb[119].mxu1  ;;  %v3188_v55 = vmax.f32 %v2932_v54, 0.0 }
 0x208   :  { %v2819_v24 = vadd.f32 %v5431_v12, %v2556_v50  ;;  %v3476_v44 = vadd.f32 %v3475_v20, %v3186_v62  ;;  %v2675_v53 = vmul.f32 %v5420_v13, %v5438_v25  ;;  %v3190_v33 = vmax.f32 %v2934_v11, 0.0 }
 0x209   :  { %v3072_v14 = vmax.f32 %v2816_v45, 0.0  ;;  %v3341_v39 = vadd.f32 %v3340_v42, %v3071_v6  ;;  %v2817_v46 = vadd.f32 %v5431_v12, %v2554_v37  ;;  %v2673_v6 = vmul.f32 %v5420_v13, %v5442_v61 }
 0x20a   :  { %v3074_v50 = vmax.f32 %v2818_v43, 0.0  ;;  %v3477_v42 = vadd.f32 %v3476_v44, %v3187_v52  ;;  %v2935_v45 = vadd.f32 %v5431_v12, %v2672_v1  ;;  %v2933_v62 = vadd.f32 %v5431_v12, %v2670_v51  ;;  %v5529_v43 = vpop.f32.mrb[120].mxu1 }
 0x20b   :  { %v3342_v8 = vadd.f32 %v3341_v39, %v3072_v14  ;;  %v3073_v34 = vmax.f32 %v2817_v46, 0.0  ;;  %v4218_v19 = vpop.f32.mrb[124].mxu0  ;;  %v3075_v54 = vmax.f32 %v2819_v24, 0.0  ;;  %v2938_v46 = vadd.f32 %v5431_v12, %v2675_v53  ;;  %v5534_v51 = vpop.f32.mrb[121].mxu1 }
 0x20c   :  { %v1899_v41 = vpop.f32.mrb[125].mxu0  ;;  %v2559_v38 = vmul.f32 %v5420_v13, %v4218_v19  ;;  %v3478_v39 = vadd.f32 %v3477_v42, %v3188_v55  ;;  %v3189_v11 = vmax.f32 %v2933_v62, 0.0  ;;  %v2936_v61 = vadd.f32 %v5431_v12, %v2673_v6  ;;  %v5539_v19 = vpop.f32.mrb[122].mxu1 }
 0x20d   :  { %v3343_v37 = vadd.f32 %v3342_v8, %v3073_v34  ;;  %v2557_v25 = vmul.f32 %v5420_v13, %v1899_v41  ;;  %v4219_v20 = vpop.f32.mrb[126].mxu0  ;;  %v3087_v8 = vmax.f32 %v5455_v21, 0.0  ;;  %v3191_v34 = vmax.f32 %v2935_v45, 0.0  ;;  %v5543_v62 = vpop.f32.mrb[123].mxu1 }
 0x20e   :  { %v1902_v14 = vpop.f32.mrb[127].mxu0  ;;  %v2560_v24 = vmul.f32 %v5420_v13, %v4219_v20  ;;  %v3479_v55 = vadd.f32 %v3478_v39, %v3189_v11  ;;  %v2676_v53 = vmul.f32 %v5420_v13, %v5448_v35  ;;  %v2822_v6 = vadd.f32 %v5431_v12, %v2559_v38 }
 0x20f   :  { %v3344_v52 = vadd.f32 %v3343_v37, %v3074_v50  ;;  %v2820_v1 = vadd.f32 %v5431_v12, %v2557_v25  ;;  %v2558_v44 = vmul.f32 %v5420_v13, %v1902_v14  ;;  %v3194_v25 = vmax.f32 %v2938_v46, 0.0 }
 0x210   :  { %v3480_v37 = vadd.f32 %v3479_v55, %v3190_v33  ;;  %v3192_v20 = vmax.f32 %v2936_v61, 0.0  ;;  %v2674_v45 = vmul.f32 %v5420_v13, %v5452_v10  ;;  %v2823_v39 = vadd.f32 %v5431_v12, %v2560_v24 }
 0x211   :  { %v3076_v50 = vmax.f32 %v2820_v1, 0.0  ;;  %v3345_v41 = vadd.f32 %v3344_v52, %v3075_v54  ;;  %v2821_v42 = vadd.f32 %v5431_v12, %v2558_v44  ;;  %v2677_v38 = vmul.f32 %v5420_v13, %v5478_v47 }
 0x212   :  { %v3481_v54 = vadd.f32 %v3480_v37, %v3191_v34  ;;  %v2939_v52 = vadd.f32 %v5431_v12, %v2676_v53  ;;  %v2937_v44 = vadd.f32 %v5431_v12, %v2674_v45  ;;  %v2679_v33 = vmul.f32 %v5420_v13, %v5474_v58 }
 0x213   :  { %v3346_v14 = vadd.f32 %v3345_v41, %v3076_v50  ;;  %v3077_v35 = vmax.f32 %v2821_v42, 0.0  ;;  %v4222_v11 = vpop.f32.mrb[128].mxu0  ;;  %v3078_v46 = vmax.f32 %v2822_v6, 0.0  ;;  %v2940_v34 = vadd.f32 %v5431_v12, %v2677_v38 }
 0x214   :  { %v1915_v1 = vpop.f32.mrb[129].mxu0  ;;  %v2563_v10 = vmul.f32 %v5420_v13, %v4222_v11  ;;  %v3482_v47 = vadd.f32 %v3481_v54, %v3192_v20  ;;  %v3193_v42 = vmax.f32 %v2937_v44, 0.0  ;;  %v3079_v53 = vmax.f32 %v2823_v39, 0.0 }
 0x215   :  { %v3347_v61 = vadd.f32 %v3346_v14, %v3077_v35  ;;  %v2561_v24 = vmul.f32 %v5420_v13, %v1915_v1  ;;  %v4223_v55 = vpop.f32.mrb[130].mxu0  ;;  %v3195_v6 = vmax.f32 %v2939_v52, 0.0  ;;  %v2942_v35 = vadd.f32 %v5431_v12, %v2679_v33 }
 0x216   :  { %v2564_v50 = vmul.f32 %v5420_v13, %v4223_v55  ;;  %v1918_v41 = vpop.f32.mrb[131].mxu0  ;;  %v3483_v14 = vadd.f32 %v3482_v47, %v3193_v42  ;;  %v2680_v11 = vmul.f32 %v5420_v13, %v5483_v26  ;;  %v2569_v1 = vmul.f32 %v5420_v13, %v4872_v56 }
 0x217   :  { %v3348_v37 = vadd.f32 %v3347_v61, %v3078_v46  ;;  %v2824_v45 = vadd.f32 %v5431_v12, %v2561_v24  ;;  %v2562_v58 = vmul.f32 %v5420_v13, %v1918_v41  ;;  %v2826_v54 = vadd.f32 %v5431_v12, %v2563_v10 }
 0x218   :  { %v2827_v38 = vadd.f32 %v5431_v12, %v2564_v50  ;;  %v3484_v44 = vadd.f32 %v3483_v14, %v3194_v25  ;;  %v3196_v46 = vmax.f32 %v2940_v34, 0.0  ;;  %v2678_v52 = vmul.f32 %v5420_v13, %v5487_v3 }
 0x219   :  { %v3349_v20 = vadd.f32 %v3348_v37, %v3079_v53  ;;  %v2825_v39 = vadd.f32 %v5431_v12, %v2562_v58  ;;  %v3080_v33 = vmax.f32 %v2824_v45, 0.0  ;;  %v2681_v26 = vmul.f32 %v5420_v13, %v5506_v16 }
 0x21a   :  { %v3198_v55 = vmax.f32 %v2942_v35, 0.0  ;;  %v3485_v56 = vadd.f32 %v3484_v44, %v3195_v6  ;;  %v2943_v41 = vadd.f32 %v5431_v12, %v2680_v11  ;;  %v2941_v10 = vadd.f32 %v5431_v12, %v2678_v52 }
 0x21b   :  { %v3350_v61 = vrot.slane %v3349_v20, 4  ;;  %v3081_v24 = vmax.f32 %v2825_v39, 0.0  ;;  %v3082_v42 = vmax.f32 %v2826_v54, 0.0  ;;  %v2682_v25 = vmul.f32 %v5420_v13, %v5515_v28 }
 0x21c   :  { %v3486_v34 = vadd.f32 %v3485_v56, %v3196_v46  ;;  %v3197_v3 = vmax.f32 %v2941_v10, 0.0  ;;  %v2683_v53 = vmul.f32 %v5420_v13, %v5501_v9  ;;  %v2944_v37 = vadd.f32 %v5431_v12, %v2681_v26 }
 0x21d   :  { %v3351_v47 = vadd.f32 %v3350_v61, %v3349_v20  ;;  %v3356_v50 = vadd.f32 %v3081_v24, %v3080_v33  ;;  %v3085_v16 = vmax.f32 %v5465_v18, 0.0  ;;  %v3083_v58 = vmax.f32 %v2827_v38, 0.0 }
 0x21e   :  { %v3199_v14 = vmax.f32 %v2943_v41, 0.0  ;;  %v3487_v35 = vadd.f32 %v3486_v34, %v3197_v3  ;;  %v2684_v11 = vmul.f32 %v5420_v13, %v5511_v32  ;;  %v2945_v20 = vadd.f32 %v5431_v12, %v2682_v25 }
 0x21f   :  { %v3352_v45 = vrot.slane %v3351_v47, 2  ;;  %v3357_v6 = vadd.f32 %v3356_v50, %v3082_v42  ;;  %v2571_v28 = vmul.f32 %v5420_v13, %v4867_v48  ;;  %v2832_v54 = vadd.f32 %v5431_v12, %v2569_v1 }
 0x220   :  { %v3488_v44 = vadd.f32 %v3487_v35, %v3198_v55  ;;  %v2946_v18 = vadd.f32 %v5431_v12, %v2683_v53  ;;  %v3200_v46 = vmax.f32 %v2944_v37, 0.0  ;;  %v2685_v38 = vmul.f32 %v5420_v13, %v5534_v51 }
 0x221   :  { %v3353_v9 = vadd.f32 %v3352_v45, %v3351_v47  ;;  %v3358_v39 = vadd.f32 %v3357_v6, %v3083_v58  ;;  %v2570_v52 = vmul.f32 %v5420_v13, %v4880_v63  ;;  %v5721_v61 = vmax.f32 %v5412_v5, 0.0 }
 0x222   :  { %v3489_v24 = vadd.f32 %v3488_v44, %v3199_v14  ;;  %v2947_v48 = vadd.f32 %v5431_v12, %v2684_v11  ;;  %v3201_v1 = vmax.f32 %v2945_v20, 0.0  ;;  %v2686_v26 = vmul.f32 %v5420_v13, %v5543_v62 }
 0x223   :  { %v3354_v32 = vrot.slane %v3353_v9, 1  ;;  %v3359_v33 = vadd.f32 %v3358_v39, %v5721_v61  ;;  %v2834_v55 = vadd.f32 %v5431_v12, %v2571_v28  ;;  %v2572_v51 = vmul.f32 %v5420_v13, %v4875_v57 }
 0x224   :  { %v3202_v41 = vmax.f32 %v2946_v18, 0.0  ;;  %v3490_v5 = vadd.f32 %v3489_v24, %v3200_v46  ;;  %v2687_v10 = vmul.f32 %v5420_v13, %v5529_v43  ;;  %v2948_v47 = vadd.f32 %v5431_v12, %v2685_v38 }
 0x225   :  { %v3355_v63 = vadd.f32 %v3354_v32, %v3353_v9  ;;  %v3360_v56 = vadd.f32 %v3359_v33, %v3085_v16  ;;  %v3088_v42 = vmax.f32 %v2832_v54, 0.0  ;;  %v2833_v62 = vadd.f32 %v5431_v12, %v2570_v52 }
 0x226   :  { %v5722_v40 = vmax.f32 %v5409_v4, 0.0  ;;  %v3203_v34 = vmax.f32 %v2947_v48, 0.0  ;;  %v3491_v3 = vadd.f32 %v3490_v5, %v3201_v1  ;;  %v2688_v57 = vmul.f32 %v5420_v13, %v5539_v19 }
 0x227   :  { %v3507_v50 = vmul.f32 0.00390625, %v3355_v63  ;;  %v2949_v53 = vadd.f32 %v5431_v12, %v2686_v26  ;;  %v2835_v37 = vadd.f32 %v5431_v12, %v2572_v51  ;;  %v2573_v43 = vmul.f32 %v5420_v13, %v4892_v22 }
 0x228   :  { %v3361_v25 = vadd.f32 %v3360_v56, %v5722_v40  ;;  %v3492_v58 = vadd.f32 %v3491_v3, %v3202_v41  ;;  %v2950_v4 = vadd.f32 %v5431_v12, %v2687_v10  ;;  %v3204_v6 = vmax.f32 %v2948_v47, 0.0 }
 0x229   :  { %v3515_v16 = vpack.c.bf16 %v3507_v50, %v3507_v50  ;;  %v3089_v14 = vmax.f32 %v2833_v62, 0.0  ;;  %v2574_v19 = vmul.f32 %v5420_v13, %v4901_v31  ;;  %v3090_v20 = vmax.f32 %v2834_v55, 0.0 }
 0x22a   :  { %v3362_v45 = vadd.f32 %v3361_v25, %v3087_v8  ;;  %v3493_v28 = vadd.f32 %v3492_v58, %v3203_v34  ;;  %v2951_v54 = vadd.f32 %v5431_v12, %v2688_v57  ;;  %v3205_v22 = vmax.f32 %v2949_v53, 0.0 }
 0x22b   :  { %v3554_v35 = vunpack.c.l.b16 %v3515_v16  ;;  %v2575_v21 = vmul.f32 %v5420_v13, %v4888_v15  ;;  %v2836_v8 = vadd.f32 %v5431_v12, %v2573_v43  ;;  %v3206_v44 = vmax.f32 %v2950_v4, 0.0 }
 0x22c   :  { %v3363_v11 = vadd.f32 %v3362_v45, %v3088_v42  ;;  %v3494_v18 = vadd.f32 %v3493_v28, %v3204_v6  ;;  %v3091_v46 = vmax.f32 %v2835_v37, 0.0  ;;  %v2576_v31 = vmul.f32 %v5420_v13, %v4895_v23 }
 0x22d   :  { %v5622_v9 = vsel %vm3563_vm6, %v3554_v35, %v5386_v30  ;;  %v2837_v38 = vadd.f32 %v5431_v12, %v2574_v19  ;;  %v3207_v32 = vmax.f32 %v2951_v54, 0.0  ;;  %v2838_v33 = vadd.f32 %v5431_v12, %v2575_v21  ;;  %v5724_v21 = vld [vmem:[#allocation13_spill] sm:$0xff] }
 0x22e   :  { %v3364_v39 = vadd.f32 %v3363_v11, %v3089_v14  ;;  %v3495_v61 = vadd.f32 %v3494_v18, %v3205_v22  ;;  %v3092_v15 = vmax.f32 %v2836_v8, 0.0  ;;  %v2577_v24 = vmul.f32 %v5420_v13, %v4913_v59  ;;  %v5723_v11 = vld [vmem:[#allocation12_spill] sm:$0xff] }
 0x22f   :  { %v2839_v1 = vadd.f32 %v5431_v12, %v2576_v31  ;;  %v3093_v26 = vmax.f32 %v2837_v38, 0.0  ;;  %v2578_v55 = vmul.f32 %v5420_v13, %v4921_v2  ;;  %v3094_v63 = vmax.f32 %v2838_v33, 0.0 }
 0x230   :  { %v3365_v52 = vadd.f32 %v3364_v39, %v3090_v20  ;;  %v3496_v48 = vadd.f32 %v3495_v61, %v3206_v44  ;;  %v2579_v56 = vmul.f32 %v5420_v13, %v4908_v49  ;;  %v2840_v41 = vadd.f32 %v5431_v12, %v2577_v24  ;;  %v5727_v24 = vld [vmem:[#allocation18_spill] sm:$0xff] }
 0x231   :  { %v3095_v10 = vmax.f32 %v2839_v1, 0.0  ;;  %v2580_v59 = vmul.f32 %v5420_v13, %v4916_v60  ;;  %v2841_v47 = vadd.f32 %v5431_v12, %v2578_v55  ;;  %v2581_v50 = vmul.f32 %v5420_v13, %v4932_v27  ;;  %v5729_v55 = vld [vmem:[#allocation19_spill] sm:$0xff] }
 0x232   :  { %v3366_v30 = vadd.f32 %v3365_v52, %v3091_v46  ;;  %v5633_v51 = vadd.f32 %v3496_v48, %v3207_v32  ;;  %v2842_v62 = vadd.f32 %v5431_v12, %v2579_v56  ;;  %v3096_v2 = vmax.f32 %v2840_v41, 0.0  ;;  %v5725_v46 = vld [vmem:[#allocation15_spill] sm:$0xff]  ;;  %v5726_v32 = vld [vmem:[#allocation17_spill] sm:$0xff]  ;;  %v5728_v48 = vld [vmem:[#allocation14_spill] sm:$0xff] }
 0x233   :  { %v2843_v25 = vadd.f32 %v5431_v12, %v2580_v59  ;;  %v3097_v49 = vmax.f32 %v2841_v47, 0.0  ;;  %v2582_v34 = vmul.f32 %v5420_v13, %v4939_v36  ;;  %v2583_v60 = vmul.f32 %v5420_v13, %v4928_v17 }
 0x234   :  { %v3367_v23 = vadd.f32 %v3366_v30, %v3092_v15  ;;  %v3098_v57 = vmax.f32 %v2842_v62, 0.0  ;;  %v2844_v53 = vadd.f32 %v5431_v12, %v2581_v50  ;;  %v2584_v16 = vmul.f32 %v5420_v13, %v4935_v29 }
 0x235   :  { %v3099_v43 = vmax.f32 %v2843_v25, 0.0  ;;  %v2845_v27 = vadd.f32 %v5431_v12, %v2582_v34  ;;  %v2846_v58 = vadd.f32 %v5431_v12, %v2583_v60  ;;  %v2585_v36 = vmul.f32 %v5420_v13, %v4950_v0 }
 0x236   :  { %v3368_v5 = vadd.f32 %v3367_v23, %v3093_v26  ;;  %v3100_v4 = vmax.f32 %v2844_v53, 0.0  ;;  %v2847_v14 = vadd.f32 %v5431_v12, %v2584_v16  ;;  %v2586_v19 = vmul.f32 %v5420_v13, %v4956_v7 }
 0x237   :  { %v3101_v17 = vmax.f32 %v2845_v27, 0.0  ;;  %v2587_v29 = vmul.f32 %v5420_v13, %v5723_v11  ;;  %v3102_v20 = vmax.f32 %v2846_v58, 0.0  ;;  %v2848_v28 = vadd.f32 %v5431_v12, %v2585_v36 }
 0x238   :  { %v3369_v42 = vadd.f32 %v3368_v5, %v3094_v63  ;;  %v3103_v22 = vmax.f32 %v2847_v14, 0.0  ;;  %v2588_v8 = vmul.f32 %v5420_v13, %v5724_v21  ;;  %v2849_v0 = vadd.f32 %v5431_v12, %v2586_v19  ;;  %v5730_v5 = vld [vmem:[#allocation16_spill] sm:$0xff] }
 0x239   :  { %v2850_v44 = vadd.f32 %v5431_v12, %v2587_v29  ;;  %v3104_v18 = vmax.f32 %v2848_v28, 0.0  ;;  %v2589_v7 = vmul.f32 %v5420_v13, %v5725_v46  ;;  %v2590_v61 = vmul.f32 %v5420_v13, %v5726_v32 }
 0x23a   :  { %v3370_v40 = vadd.f32 %v3369_v42, %v3095_v10  ;;  %v2851_v38 = vadd.f32 %v5431_v12, %v2588_v8  ;;  %v3105_v52 = vmax.f32 %v2849_v0, 0.0  ;;  %v3424_v30 = vrot.slane %v5727_v24, 4 }
 0x23b   :  { %v3106_v15 = vmax.f32 %v2850_v44, 0.0  ;;  %v2591_v1 = vmul.f32 %v5420_v13, %v5728_v48  ;;  %v2852_v26 = vadd.f32 %v5431_v12, %v2589_v7  ;;  %v3461_v23 = vrot.slane %v5729_v55, 4 }
 0x23c   :  { %v3371_v3 = vadd.f32 %v3370_v40, %v3096_v2  ;;  %v3498_v56 = vrot.slane %v5633_v51, 4  ;;  %v3107_v41 = vmax.f32 %v2851_v38, 0.0  ;;  %v2592_v10 = vmul.f32 %v5420_v13, %v5730_v5 }
 0x23d   :  { %v2853_v59 = vadd.f32 %v5431_v12, %v2590_v61  ;;  %v3425_v42 = vadd.f32 %v3424_v30, %v5727_v24  ;;  %v2854_v62 = vadd.f32 %v5431_v12, %v2591_v1  ;;  %v3108_v2 = vmax.f32 %v2852_v26, 0.0  ;;  %v3940_v24 = vld [vmem:[%s5706_s5] ss:$0 sm:$0xff] }
 0x23e   :  { %v3372_v37 = vadd.f32 %v3371_v3, %v3097_v49  ;;  %v3462_v50 = vadd.f32 %v3461_v23, %v5729_v55  ;;  %v3499_v25 = vadd.f32 %v3498_v56, %v5633_v51  ;;  %v2855_v49 = vadd.f32 %v5431_v12, %v2592_v10 }
 0x23f   :  { %v3109_v34 = vmax.f32 %v2853_v59, 0.0  ;;  %v3110_v60 = vmax.f32 %v2854_v62, 0.0 }
 0x240   :  { %v3373_v45 = vadd.f32 %v3372_v37, %v3098_v57  ;;  %v3426_v57 = vrot.slane %v3425_v42, 2  ;;  %v3463_v13 = vrot.slane %v3462_v50, 2  ;;  %v3500_v37 = vrot.slane %v3499_v25, 2 }
 0x242   :  { %v3374_v6 = vadd.f32 %v3373_v45, %v3099_v43  ;;  %v3111_v43 = vmax.f32 %v2855_v49, 0.0  ;;  %v3427_v27 = vadd.f32 %v3426_v57, %v3425_v42  ;;  %v3464_v45 = vadd.f32 %v3463_v13, %v3462_v50 }
 0x244   :  { %v3375_v35 = vadd.f32 %v3374_v6, %v3100_v4  ;;  %v3501_v4 = vadd.f32 %v3500_v37, %v3499_v25  ;;  %v3428_v6 = vrot.slane %v3427_v27, 1  ;;  %v3465_v14 = vrot.slane %v3464_v45, 1 }
 0x246   :  { %v3376_v54 = vadd.f32 %v3375_v35, %v3101_v17  ;;  %v3502_v51 = vrot.slane %v3501_v4, 1  ;;  %v3429_v12 = vadd.f32 %v3428_v6, %v3427_v27  ;;  %v3466_v35 = vadd.f32 %v3465_v14, %v3464_v45 }
 0x248   :  { %v3377_v39 = vadd.f32 %v3376_v54, %v3102_v20  ;;  %v3503_v29 = vadd.f32 %v3502_v51, %v3501_v4  ;;  %v3509_v28 = vmul.f32 0.00390625, %v3429_v12  ;;  %v3510_v54 = vmul.f32 0.00390625, %v3466_v35 }
 0x24a   :  { %v3378_v31 = vadd.f32 %v3377_v39, %v3103_v22  ;;  %v3511_v21 = vmul.f32 0.00390625, %v3503_v29  ;;  %v3517_v0 = vpack.c.bf16 %v3509_v28, %v3509_v28  ;;  %v3518_v39 = vpack.c.bf16 %v3510_v54, %v3510_v54 }
 0x24c   :  { %v3379_v33 = vadd.f32 %v3378_v31, %v3104_v18  ;;  %v3519_v18 = vpack.c.bf16 %v3511_v21, %v3511_v21  ;;  %v3556_v7 = vunpack.c.l.b16 %v3517_v0  ;;  %v3557_v31 = vunpack.c.l.b16 %v3518_v39 }
 0x24e   :  { %v3380_v63 = vadd.f32 %v3379_v33, %v3105_v52  ;;  %v3558_v52 = vunpack.c.l.b16 %v3519_v18 }
 0x250   :  { %v3381_v47 = vadd.f32 %v3380_v63, %v3106_v15 }
 0x252   :  { %v3382_v40 = vadd.f32 %v3381_v47, %v3107_v41 }
 0x254   :  { %v3383_v3 = vadd.f32 %v3382_v40, %v3108_v2 }
 0x256   :  { %v3384_v53 = vadd.f32 %v3383_v3, %v3109_v34 }
 0x258   :  { %v3385_v16 = vadd.f32 %v3384_v53, %v3110_v60 }
 0x25a   :  { %v3386_v58 = vadd.f32 %v3385_v16, %v3111_v43 }
 0x25c   :  { %v3387_v36 = vrot.slane %v3386_v58, 4 }
 0x25e   :  { %v3388_v17 = vadd.f32 %v3387_v36, %v3386_v58 }
 0x260   :  { %v3389_v19 = vrot.slane %v3388_v17, 2 }
 0x262   :  { %v3390_v11 = vadd.f32 %v3389_v19, %v3388_v17 }
 0x264   :  { %v3391_v20 = vrot.slane %v3390_v11, 1 }
 0x266   :  { %v3392_v22 = vadd.f32 %v3391_v20, %v3390_v11 }
 0x268   :  { %v3508_v8 = vmul.f32 0.00390625, %v3392_v22 }
 0x26a   :  { %v3516_v44 = vpack.c.bf16 %v3508_v8, %v3508_v8 }
 0x26c   :  { %v3555_v46 = vunpack.c.l.b16 %v3516_v44 }
 0x26e   :  { %v3566_v38 = vsel %vm3565_vm7, %v3555_v46, %v5622_v9 }
 0x26f   :  { %v3568_v32 = vsel %vm3567_vm8, %v3556_v7, %v3566_v38 }
 0x270   :  { %v3570_v61 = vsel %vm3569_vm9, %v3557_v31, %v3568_v32 }
 0x271   :  { %v3572_v33 = vsel %vm3571_vm10, %v3558_v52, %v3570_v61 }
 0x272   :  { %v3573_v15 = vpack.c.b16 %v3572_v33, %v3572_v33 }
 0x274   :  { %4365 = vmatmul.mubr.bf16.vlgmr.msra.gmra.mrb[124].mxu1 %v3573_v15 }
 0x347   :  { %v3657_v30 = vpop.f32.mrb[124].mxu1 }
 0x348   :  { %v3658_v48 = vadd.f32 %v3940_v24, %v3657_v30  ;;  %v4366_v1 = vpop.f32.mrb[125].mxu1 }
 0x349   :  { %v3660_v26 = vpop.f32.mrb[126].mxu1 }
 0x34a   :  { %3663 = vst [vmem:[#allocation8] sm:$0xff] %v3658_v48  ;;  %v4367_v9 = vpop.f32.mrb[127].mxu1 }
 0x34b   :  { %4600 = shalt.err (!%p4597_p0)
}
 0x34c   :  { %s4601_s5 = scalar_lea.hbm %s5707_s6, 128 }
 0x34d   :  { %p4602_p1 = scmp.ne.s32.totalorder %s5707_s6, %s4601_s5  ;;  %p4605_p2 = scmp.lt.u32.totalorder %s4601_s5, %s5707_s6 }
 0x34f   :  { %p4607_p3 = pnand %p4605_p2, %p4602_p1 }
 0x351   :  { %4610 = shalt.err (!%p4607_p3)
}
 0x352   :  { %3673 = dma.vmem_to_hbm [thread:$0]  %s3671_s1, 128, %s5707_s6, [#allocation4]  }
 0x353   :  { %4615 = dma.done.wait [#allocation4], 128  }
 0x354   :  { %4616 = vsyncadd [#allocation4], 4294967168 }
 0x355   :  { %3677 = vsyncpa [#allocation3], 1 }
 0x356   :  { %3678 = vsyncpa [#allocation6], 1 }
 0x357   :  { %3679 = vsyncpa [#allocation4], 1 }

</bundles_post_ra>
